<compile_context>
chip_gen: v5e
topology: v5e:2x2
jax: 0.10.0
libtpu: 0.0.40
codegen_flags: <defaults>
</compile_context>

<pallas_src>
import jax
import jax.numpy as jnp
from jax.experimental import pallas as pl
from jax.experimental.pallas import tpu as pltpu


def lstm_kernel(x_ref, w_ih_ref, w_hh_ref, b_ref, w_lin_ref, b_lin_ref,
                out_ref, xgb_ref):
    """Whole LSTM recurrence + final linear layer in one kernel invocation.

    x_ref     : (L, 1)       input sequence (input_size == 1)
    w_ih_ref  : (1, 4*Hp)    input->gates weight; i/f/o slabs pre-scaled by 0.5
    w_hh_ref  : (Hp, 4*Hp)   hidden->gates weight (transposed, padded, pre-scaled)
    b_ref     : (1, 4*Hp)    bias_ih + bias_hh (padded, pre-scaled)
    w_lin_ref : (Hp, Op)     linear weight (transposed + padded)
    b_lin_ref : (1, Op)      linear bias (padded)
    out_ref   : (1, Op)      prediction for the LAST timestep (cols >= O are 0)
    xgb_ref   : (L, 4*Hp)    VMEM scratch: per-step input projection + bias
    """
    L = x_ref.shape[0]
    Hp = w_hh_ref.shape[0]                     # padded per-gate / hidden width (128)

    # ---- loop-invariant work hoisted out of the recurrence -----------------
    # input_size == 1 -> x @ W_ih is a scalar broadcast multiply (VPU); fuse
    # the bias in.  One shot for the whole sequence.
    xgb_ref[...] = x_ref[...] * w_ih_ref[...] + b_ref[...]      # (L, 4*Hp)

    def step(t, carry):
        h, c = carry
        # (1, Hp) @ (Hp, 4*Hp); W_hh read straight from VMEM (no vreg hoist).
        hg = jnp.dot(h, w_hh_ref[...], preferred_element_type=jnp.float32)
        gates = xgb_ref[pl.ds(t, 1), :] + hg                     # (1, 4*Hp)

        # Single tanh over the whole gates row (one EUP chain); sigmoids are
        # recovered via sigmoid(a) = 0.5*tanh(a/2) + 0.5 (a/2 folded into
        # weights by the wrapper).  Gate order matches PyTorch [i, f, g, o].
        tg = jnp.tanh(gates)
        i = tg[:, 0 * Hp:1 * Hp] * 0.5 + 0.5
        f = tg[:, 1 * Hp:2 * Hp] * 0.5 + 0.5
        g = tg[:, 2 * Hp:3 * Hp]
        o = tg[:, 3 * Hp:4 * Hp] * 0.5 + 0.5

        c_new = f * c + i * g
        h_new = o * jnp.tanh(c_new)
        return (h_new, c_new)

    h0 = jnp.zeros((1, Hp), jnp.float32)
    c0 = jnp.zeros((1, Hp), jnp.float32)
    # Modest unroll: cross-step overlap without icache / compile blowup.
    h_last, _ = jax.lax.fori_loop(0, L, step, (h0, c0), unroll=min(L, 8))

    out_ref[...] = (jnp.dot(h_last, w_lin_ref[...],
                            preferred_element_type=jnp.float32)
                    + b_lin_ref[...])


def _pad_to(a, shape):
    return jnp.pad(a, [(0, s - d) for d, s in zip(a.shape, shape)])


def lstm_forward(input_seq, params):
    """Mirrors LSTM.forward: returns predictions[-1], shape (output_size,)."""
    w_ih, w_hh, b_ih, b_hh, w_lin, b_lin = params
    L = input_seq.shape[0]
    I = w_ih.shape[1]
    H = w_hh.shape[1]
    O = w_lin.shape[0]

    Hp = 128                                   # lane-aligned per-gate / hidden width
    Op = 128                                   # lane-aligned output width
    assert I == 1, "kernel relies on input_size == 1 (scalar broadcast input proj)"
    assert H <= Hp, f"hidden_size must be <= {Hp} (got {H}); >128 tiling not implemented"
    assert O <= Op, f"output_size must be <= {Op} (got {O})"

    x = input_seq.reshape(L, 1).astype(jnp.float32)

    # Fold the sigmoid->tanh pre-scale (0.5 on the i, f, o slabs) into the
    # weights, then zero-pad each gate slab / the contraction dim to 128 lanes.
    # Zero padding keeps the padded lanes of h/c exactly 0 every step
    # (pad gates = 0 -> i=f=o=0.5, g=0 -> c_pad = h_pad = 0).
    gate_scale = jnp.array([0.5, 0.5, 1.0, 0.5], jnp.float32)   # [i, f, g, o]

    w_ih_g = _pad_to(w_ih.astype(jnp.float32).reshape(4, H) * gate_scale[:, None],
                     (4, Hp)).reshape(1, 4 * Hp)
    b_g = _pad_to((b_ih + b_hh).astype(jnp.float32).reshape(4, H) * gate_scale[:, None],
                  (4, Hp)).reshape(1, 4 * Hp)
    # (Hp, 4*Hp):  [k, g*Hp + j] = scale[g] * w_hh[g*H + j, k]  for k, j < H, else 0.
    w_hh_g = _pad_to(w_hh.astype(jnp.float32).T.reshape(H, 4, H)
                     * gate_scale[None, :, None],
                     (Hp, 4, Hp)).reshape(Hp, 4 * Hp)
    w_lin_p = _pad_to(w_lin.astype(jnp.float32).T, (Hp, Op))
    b_lin_p = _pad_to(b_lin.astype(jnp.float32).reshape(1, O), (1, Op))

    cost = pl.CostEstimate(
        flops=2 * L * Hp * 4 * Hp + 2 * L * 4 * Hp + 2 * Hp * Op,
        transcendentals=5 * L * Hp,
        bytes_accessed=4 * (L + 4 * Hp + Hp * 4 * Hp + 4 * Hp + Hp * Op + Op + Op),
    )

    vmem = pl.BlockSpec(memory_space=pltpu.MemorySpace.VMEM)
    pred = pl.pallas_call(
        lstm_kernel,
        out_shape=jax.ShapeDtypeStruct((1, Op), jnp.float32),
        in_specs=[vmem] * 6,
        out_specs=vmem,
        scratch_shapes=[pltpu.VMEM((L, 4 * Hp), jnp.float32)],
        cost_estimate=cost,
    )(x, w_ih_g, w_hh_g, b_g, w_lin_p, b_lin_p)
    return pred[0, :O]                         # == predictions[-1]


def reference_forward(input_seq, params):
    """Pure-JAX reference matching torch.nn.LSTM + nn.Linear semantics."""
    w_ih, w_hh, b_ih, b_hh, w_lin, b_lin = params
    L = input_seq.shape[0]
    I = w_ih.shape[1]
    H = w_hh.shape[1]
    x = input_seq.reshape(L, I).astype(jnp.float32)
    h = jnp.zeros((H,), jnp.float32)
    c = jnp.zeros((H,), jnp.float32)
    for t in range(L):
        gates = w_ih @ x[t] + b_ih + w_hh @ h + b_hh
        i = jax.nn.sigmoid(gates[0 * H:1 * H])
        f = jax.nn.sigmoid(gates[1 * H:2 * H])
        g = jnp.tanh(gates[2 * H:3 * H])
        o = jax.nn.sigmoid(gates[3 * H:4 * H])
        c = f * c + i * g
        h = o * jnp.tanh(c)
    return w_lin @ h + b_lin


def init_params(key, input_size, hidden_size, output_size):
    """Deterministic init, same shapes as nn.LSTM / nn.Linear parameters."""
    ks = jax.random.split(key, 6)
    k = 1.0 / jnp.sqrt(hidden_size)
    u = lambda kk, shape: jax.random.uniform(kk, shape, jnp.float32, -k, k)
    w_ih = u(ks[0], (4 * hidden_size, input_size))   # weight_ih_l0
    w_hh = u(ks[1], (4 * hidden_size, hidden_size))  # weight_hh_l0
    b_ih = u(ks[2], (4 * hidden_size,))              # bias_ih_l0
    b_hh = u(ks[3], (4 * hidden_size,))              # bias_hh_l0
    w_lin = u(ks[4], (output_size, hidden_size))     # linear.weight
    b_lin = u(ks[5], (output_size,))                 # linear.bias
    return (w_ih, w_hh, b_ih, b_hh, w_lin, b_lin)


if __name__ == "__main__":
    INPUT_SIZE = 1
    HIDDEN = 32       # small-shape stand-in for hidden_layer_size=100
    OUTPUT = 2
    SEQ_LEN = 8

    key = jax.random.PRNGKey(0)
    k_params, k_x = jax.random.split(key)
    params = init_params(k_params, INPUT_SIZE, HIDDEN, OUTPUT)
    input_seq = jax.random.normal(k_x, (SEQ_LEN,), jnp.float32)

    out = lstm_forward(input_seq, params)
    out = jax.block_until_ready(out)

    ref = reference_forward(input_seq, params)
    assert out.shape == (OUTPUT,), out.shape
    assert jnp.allclose(out, ref, atol=1e-5, rtol=1e-5), (out, ref)

    print("KERNEL_OK")
</pallas_src>

<mosaic_0001>
module attributes {stable_mosaic.version = 11 : i64} {
  func.func @lstm_kernel(%arg0: memref<8x1xf32, #tpu.memory_space<vmem>>, %arg1: memref<1x512xf32, #tpu.memory_space<vmem>>, %arg2: memref<128x512xf32, #tpu.memory_space<vmem>>, %arg3: memref<1x512xf32, #tpu.memory_space<vmem>>, %arg4: memref<128x128xf32, #tpu.memory_space<vmem>>, %arg5: memref<1x128xf32, #tpu.memory_space<vmem>>, %arg6: memref<1x128xf32, #tpu.memory_space<vmem>>, %arg7: memref<8x512xf32, #tpu.memory_space<vmem>>) attributes {dimension_semantics = [], scalar_prefetch = 0 : i64, scratch_operands = 1 : i64, tpu.core_type = #tpu.core_type<tc>} {
    %c0 = arith.constant 0 : index
    %c0_0 = arith.constant 0 : index
    %0 = vector.load %arg0[%c0, %c0_0] : memref<8x1xf32, #tpu.memory_space<vmem>>, vector<8x1xf32>
    %c0_1 = arith.constant 0 : index
    %c0_2 = arith.constant 0 : index
    %1 = vector.load %arg1[%c0_1, %c0_2] : memref<1x512xf32, #tpu.memory_space<vmem>>, vector<1x512xf32>
    %2 = vector.broadcast %0 : vector<8x1xf32> to vector<8x512xf32>
    %3 = vector.broadcast %1 : vector<1x512xf32> to vector<8x512xf32>
    %4 = arith.mulf %2, %3 : vector<8x512xf32>
    %c0_3 = arith.constant 0 : index
    %c0_4 = arith.constant 0 : index
    %5 = vector.load %arg3[%c0_3, %c0_4] : memref<1x512xf32, #tpu.memory_space<vmem>>, vector<1x512xf32>
    %6 = vector.broadcast %5 : vector<1x512xf32> to vector<8x512xf32>
    %7 = arith.addf %4, %6 : vector<8x512xf32>
    %c0_5 = arith.constant 0 : index
    %c0_6 = arith.constant 0 : index
    %8 = vector.load %arg7[%c0_5, %c0_6] : memref<8x512xf32, #tpu.memory_space<vmem>>, vector<8x512xf32>
    tpu.vector_store %arg7[%c0_5, %c0_6], %7 {strides = array<i32>} : memref<8x512xf32, #tpu.memory_space<vmem>>, vector<8x512xf32>,
    %cst = arith.constant 0.000000e+00 : f32
    %9 = vector.broadcast %cst : f32 to vector<1x128xf32>
    %cst_7 = arith.constant 0.000000e+00 : f32
    %10 = vector.broadcast %cst_7 : f32 to vector<1x128xf32>
    %c0_i32 = arith.constant 0 : i32
    %c0_8 = arith.constant 0 : index
    %c0_9 = arith.constant 0 : index
    %11 = vector.load %arg2[%c0_8, %c0_9] : memref<128x512xf32, #tpu.memory_space<vmem>>, vector<128x512xf32>
    %cst_10 = arith.constant dense<0.000000e+00> : vector<1x512xf32>
    %12 = tpu.matmul %9, %11, %cst_10 {dimension_numbers = #tpu.dot_dimension_numbers<[1], [0], [0], [1], [0, 0, 1, 1], [], []>} : vector<1x128xf32>, vector<128x512xf32>, vector<1x512xf32> -> vector<1x512xf32>
    %13 = arith.index_cast %c0_i32 : i32 to index
    %c0_11 = arith.constant 0 : index
    %14 = vector.load %arg7[%13, %c0_11] : memref<8x512xf32, #tpu.memory_space<vmem>>, vector<1x512xf32>
    %15 = arith.addf %14, %12 : vector<1x512xf32>
    %16 = math.tanh %15 : vector<1x512xf32>
    %17 = vector.extract_strided_slice %16 {offsets = [0, 0], sizes = [1, 128], strides = [1, 1]} : vector<1x512xf32> to vector<1x128xf32>
    %cst_12 = arith.constant 5.000000e-01 : f32
    %18 = vector.broadcast %cst_12 : f32 to vector<1x128xf32>
    %19 = arith.mulf %17, %18 : vector<1x128xf32>
    %cst_13 = arith.constant 5.000000e-01 : f32
    %20 = vector.broadcast %cst_13 : f32 to vector<1x128xf32>
    %21 = arith.addf %19, %20 : vector<1x128xf32>
    %22 = vector.extract_strided_slice %16 {offsets = [0, 128], sizes = [1, 128], strides = [1, 1]} : vector<1x512xf32> to vector<1x128xf32>
    %cst_14 = arith.constant 5.000000e-01 : f32
    %23 = vector.broadcast %cst_14 : f32 to vector<1x128xf32>
    %24 = arith.mulf %22, %23 : vector<1x128xf32>
    %cst_15 = arith.constant 5.000000e-01 : f32
    %25 = vector.broadcast %cst_15 : f32 to vector<1x128xf32>
    %26 = arith.addf %24, %25 : vector<1x128xf32>
    %27 = vector.extract_strided_slice %16 {offsets = [0, 256], sizes = [1, 128], strides = [1, 1]} : vector<1x512xf32> to vector<1x128xf32>
    %28 = vector.extract_strided_slice %16 {offsets = [0, 384], sizes = [1, 128], strides = [1, 1]} : vector<1x512xf32> to vector<1x128xf32>
    %cst_16 = arith.constant 5.000000e-01 : f32
    %29 = vector.broadcast %cst_16 : f32 to vector<1x128xf32>
    %30 = arith.mulf %28, %29 : vector<1x128xf32>
    %cst_17 = arith.constant 5.000000e-01 : f32
    %31 = vector.broadcast %cst_17 : f32 to vector<1x128xf32>
    %32 = arith.addf %30, %31 : vector<1x128xf32>
    %33 = arith.mulf %26, %10 : vector<1x128xf32>
    %34 = arith.mulf %21, %27 : vector<1x128xf32>
    %35 = arith.addf %33, %34 : vector<1x128xf32>
    %36 = math.tanh %35 : vector<1x128xf32>
    %37 = arith.mulf %32, %36 : vector<1x128xf32>
    %c1_i32 = arith.constant 1 : i32
    %c0_18 = arith.constant 0 : index
    %c0_19 = arith.constant 0 : index
    %38 = vector.load %arg2[%c0_18, %c0_19] : memref<128x512xf32, #tpu.memory_space<vmem>>, vector<128x512xf32>
    %cst_20 = arith.constant dense<0.000000e+00> : vector<1x512xf32>
    %39 = tpu.matmul %37, %38, %cst_20 {dimension_numbers = #tpu.dot_dimension_numbers<[1], [0], [0], [1], [0, 0, 1, 1], [], []>} : vector<1x128xf32>, vector<128x512xf32>, vector<1x512xf32> -> vector<1x512xf32>
    %40 = arith.index_cast %c1_i32 : i32 to index
    %c0_21 = arith.constant 0 : index
    %41 = vector.load %arg7[%40, %c0_21] : memref<8x512xf32, #tpu.memory_space<vmem>>, vector<1x512xf32>
    %42 = arith.addf %41, %39 : vector<1x512xf32>
    %43 = math.tanh %42 : vector<1x512xf32>
    %44 = vector.extract_strided_slice %43 {offsets = [0, 0], sizes = [1, 128], strides = [1, 1]} : vector<1x512xf32> to vector<1x128xf32>
    %cst_22 = arith.constant 5.000000e-01 : f32
    %45 = vector.broadcast %cst_22 : f32 to vector<1x128xf32>
    %46 = arith.mulf %44, %45 : vector<1x128xf32>
    %cst_23 = arith.constant 5.000000e-01 : f32
    %47 = vector.broadcast %cst_23 : f32 to vector<1x128xf32>
    %48 = arith.addf %46, %47 : vector<1x128xf32>
    %49 = vector.extract_strided_slice %43 {offsets = [0, 128], sizes = [1, 128], strides = [1, 1]} : vector<1x512xf32> to vector<1x128xf32>
    %cst_24 = arith.constant 5.000000e-01 : f32
    %50 = vector.broadcast %cst_24 : f32 to vector<1x128xf32>
    %51 = arith.mulf %49, %50 : vector<1x128xf32>
    %cst_25 = arith.constant 5.000000e-01 : f32
    %52 = vector.broadcast %cst_25 : f32 to vector<1x128xf32>
    %53 = arith.addf %51, %52 : vector<1x128xf32>
    %54 = vector.extract_strided_slice %43 {offsets = [0, 256], sizes = [1, 128], strides = [1, 1]} : vector<1x512xf32> to vector<1x128xf32>
    %55 = vector.extract_strided_slice %43 {offsets = [0, 384], sizes = [1, 128], strides = [1, 1]} : vector<1x512xf32> to vector<1x128xf32>
    %cst_26 = arith.constant 5.000000e-01 : f32
    %56 = vector.broadcast %cst_26 : f32 to vector<1x128xf32>
    %57 = arith.mulf %55, %56 : vector<1x128xf32>
    %cst_27 = arith.constant 5.000000e-01 : f32
    %58 = vector.broadcast %cst_27 : f32 to vector<1x128xf32>
    %59 = arith.addf %57, %58 : vector<1x128xf32>
    %60 = arith.mulf %53, %35 : vector<1x128xf32>
    %61 = arith.mulf %48, %54 : vector<1x128xf32>
    %62 = arith.addf %60, %61 : vector<1x128xf32>
    %63 = math.tanh %62 : vector<1x128xf32>
    %64 = arith.mulf %59, %63 : vector<1x128xf32>
    %c2_i32 = arith.constant 2 : i32
    %c0_28 = arith.constant 0 : index
    %c0_29 = arith.constant 0 : index
    %65 = vector.load %arg2[%c0_28, %c0_29] : memref<128x512xf32, #tpu.memory_space<vmem>>, vector<128x512xf32>
    %cst_30 = arith.constant dense<0.000000e+00> : vector<1x512xf32>
    %66 = tpu.matmul %64, %65, %cst_30 {dimension_numbers = #tpu.dot_dimension_numbers<[1], [0], [0], [1], [0, 0, 1, 1], [], []>} : vector<1x128xf32>, vector<128x512xf32>, vector<1x512xf32> -> vector<1x512xf32>
    %67 = arith.index_cast %c2_i32 : i32 to index
    %c0_31 = arith.constant 0 : index
    %68 = vector.load %arg7[%67, %c0_31] : memref<8x512xf32, #tpu.memory_space<vmem>>, vector<1x512xf32>
    %69 = arith.addf %68, %66 : vector<1x512xf32>
    %70 = math.tanh %69 : vector<1x512xf32>
    %71 = vector.extract_strided_slice %70 {offsets = [0, 0], sizes = [1, 128], strides = [1, 1]} : vector<1x512xf32> to vector<1x128xf32>
    %cst_32 = arith.constant 5.000000e-01 : f32
    %72 = vector.broadcast %cst_32 : f32 to vector<1x128xf32>
    %73 = arith.mulf %71, %72 : vector<1x128xf32>
    %cst_33 = arith.constant 5.000000e-01 : f32
    %74 = vector.broadcast %cst_33 : f32 to vector<1x128xf32>
    %75 = arith.addf %73, %74 : vector<1x128xf32>
    %76 = vector.extract_strided_slice %70 {offsets = [0, 128], sizes = [1, 128], strides = [1, 1]} : vector<1x512xf32> to vector<1x128xf32>
    %cst_34 = arith.constant 5.000000e-01 : f32
    %77 = vector.broadcast %cst_34 : f32 to vector<1x128xf32>
    %78 = arith.mulf %76, %77 : vector<1x128xf32>
    %cst_35 = arith.constant 5.000000e-01 : f32
    %79 = vector.broadcast %cst_35 : f32 to vector<1x128xf32>
    %80 = arith.addf %78, %79 : vector<1x128xf32>
    %81 = vector.extract_strided_slice %70 {offsets = [0, 256], sizes = [1, 128], strides = [1, 1]} : vector<1x512xf32> to vector<1x128xf32>
    %82 = vector.extract_strided_slice %70 {offsets = [0, 384], sizes = [1, 128], strides = [1, 1]} : vector<1x512xf32> to vector<1x128xf32>
    %cst_36 = arith.constant 5.000000e-01 : f32
    %83 = vector.broadcast %cst_36 : f32 to vector<1x128xf32>
    %84 = arith.mulf %82, %83 : vector<1x128xf32>
    %cst_37 = arith.constant 5.000000e-01 : f32
    %85 = vector.broadcast %cst_37 : f32 to vector<1x128xf32>
    %86 = arith.addf %84, %85 : vector<1x128xf32>
    %87 = arith.mulf %80, %62 : vector<1x128xf32>
    %88 = arith.mulf %75, %81 : vector<1x128xf32>
    %89 = arith.addf %87, %88 : vector<1x128xf32>
    %90 = math.tanh %89 : vector<1x128xf32>
    %91 = arith.mulf %86, %90 : vector<1x128xf32>
    %c3_i32 = arith.constant 3 : i32
    %c0_38 = arith.constant 0 : index
    %c0_39 = arith.constant 0 : index
    %92 = vector.load %arg2[%c0_38, %c0_39] : memref<128x512xf32, #tpu.memory_space<vmem>>, vector<128x512xf32>
    %cst_40 = arith.constant dense<0.000000e+00> : vector<1x512xf32>
    %93 = tpu.matmul %91, %92, %cst_40 {dimension_numbers = #tpu.dot_dimension_numbers<[1], [0], [0], [1], [0, 0, 1, 1], [], []>} : vector<1x128xf32>, vector<128x512xf32>, vector<1x512xf32> -> vector<1x512xf32>
    %94 = arith.index_cast %c3_i32 : i32 to index
    %c0_41 = arith.constant 0 : index
    %95 = vector.load %arg7[%94, %c0_41] : memref<8x512xf32, #tpu.memory_space<vmem>>, vector<1x512xf32>
    %96 = arith.addf %95, %93 : vector<1x512xf32>
    %97 = math.tanh %96 : vector<1x512xf32>
    %98 = vector.extract_strided_slice %97 {offsets = [0, 0], sizes = [1, 128], strides = [1, 1]} : vector<1x512xf32> to vector<1x128xf32>
    %cst_42 = arith.constant 5.000000e-01 : f32
    %99 = vector.broadcast %cst_42 : f32 to vector<1x128xf32>
    %100 = arith.mulf %98, %99 : vector<1x128xf32>
    %cst_43 = arith.constant 5.000000e-01 : f32
    %101 = vector.broadcast %cst_43 : f32 to vector<1x128xf32>
    %102 = arith.addf %100, %101 : vector<1x128xf32>
    %103 = vector.extract_strided_slice %97 {offsets = [0, 128], sizes = [1, 128], strides = [1, 1]} : vector<1x512xf32> to vector<1x128xf32>
    %cst_44 = arith.constant 5.000000e-01 : f32
    %104 = vector.broadcast %cst_44 : f32 to vector<1x128xf32>
    %105 = arith.mulf %103, %104 : vector<1x128xf32>
    %cst_45 = arith.constant 5.000000e-01 : f32
    %106 = vector.broadcast %cst_45 : f32 to vector<1x128xf32>
    %107 = arith.addf %105, %106 : vector<1x128xf32>
    %108 = vector.extract_strided_slice %97 {offsets = [0, 256], sizes = [1, 128], strides = [1, 1]} : vector<1x512xf32> to vector<1x128xf32>
    %109 = vector.extract_strided_slice %97 {offsets = [0, 384], sizes = [1, 128], strides = [1, 1]} : vector<1x512xf32> to vector<1x128xf32>
    %cst_46 = arith.constant 5.000000e-01 : f32
    %110 = vector.broadcast %cst_46 : f32 to vector<1x128xf32>
    %111 = arith.mulf %109, %110 : vector<1x128xf32>
    %cst_47 = arith.constant 5.000000e-01 : f32
    %112 = vector.broadcast %cst_47 : f32 to vector<1x128xf32>
    %113 = arith.addf %111, %112 : vector<1x128xf32>
    %114 = arith.mulf %107, %89 : vector<1x128xf32>
    %115 = arith.mulf %102, %108 : vector<1x128xf32>
    %116 = arith.addf %114, %115 : vector<1x128xf32>
    %117 = math.tanh %116 : vector<1x128xf32>
    %118 = arith.mulf %113, %117 : vector<1x128xf32>
    %c4_i32 = arith.constant 4 : i32
    %c0_48 = arith.constant 0 : index
    %c0_49 = arith.constant 0 : index
    %119 = vector.load %arg2[%c0_48, %c0_49] : memref<128x512xf32, #tpu.memory_space<vmem>>, vector<128x512xf32>
    %cst_50 = arith.constant dense<0.000000e+00> : vector<1x512xf32>
    %120 = tpu.matmul %118, %119, %cst_50 {dimension_numbers = #tpu.dot_dimension_numbers<[1], [0], [0], [1], [0, 0, 1, 1], [], []>} : vector<1x128xf32>, vector<128x512xf32>, vector<1x512xf32> -> vector<1x512xf32>
    %121 = arith.index_cast %c4_i32 : i32 to index
    %c0_51 = arith.constant 0 : index
    %122 = vector.load %arg7[%121, %c0_51] : memref<8x512xf32, #tpu.memory_space<vmem>>, vector<1x512xf32>
    %123 = arith.addf %122, %120 : vector<1x512xf32>
    %124 = math.tanh %123 : vector<1x512xf32>
    %125 = vector.extract_strided_slice %124 {offsets = [0, 0], sizes = [1, 128], strides = [1, 1]} : vector<1x512xf32> to vector<1x128xf32>
    %cst_52 = arith.constant 5.000000e-01 : f32
    %126 = vector.broadcast %cst_52 : f32 to vector<1x128xf32>
    %127 = arith.mulf %125, %126 : vector<1x128xf32>
    %cst_53 = arith.constant 5.000000e-01 : f32
    %128 = vector.broadcast %cst_53 : f32 to vector<1x128xf32>
    %129 = arith.addf %127, %128 : vector<1x128xf32>
    %130 = vector.extract_strided_slice %124 {offsets = [0, 128], sizes = [1, 128], strides = [1, 1]} : vector<1x512xf32> to vector<1x128xf32>
    %cst_54 = arith.constant 5.000000e-01 : f32
    %131 = vector.broadcast %cst_54 : f32 to vector<1x128xf32>
    %132 = arith.mulf %130, %131 : vector<1x128xf32>
    %cst_55 = arith.constant 5.000000e-01 : f32
    %133 = vector.broadcast %cst_55 : f32 to vector<1x128xf32>
    %134 = arith.addf %132, %133 : vector<1x128xf32>
    %135 = vector.extract_strided_slice %124 {offsets = [0, 256], sizes = [1, 128], strides = [1, 1]} : vector<1x512xf32> to vector<1x128xf32>
    %136 = vector.extract_strided_slice %124 {offsets = [0, 384], sizes = [1, 128], strides = [1, 1]} : vector<1x512xf32> to vector<1x128xf32>
    %cst_56 = arith.constant 5.000000e-01 : f32
    %137 = vector.broadcast %cst_56 : f32 to vector<1x128xf32>
    %138 = arith.mulf %136, %137 : vector<1x128xf32>
    %cst_57 = arith.constant 5.000000e-01 : f32
    %139 = vector.broadcast %cst_57 : f32 to vector<1x128xf32>
    %140 = arith.addf %138, %139 : vector<1x128xf32>
    %141 = arith.mulf %134, %116 : vector<1x128xf32>
    %142 = arith.mulf %129, %135 : vector<1x128xf32>
    %143 = arith.addf %141, %142 : vector<1x128xf32>
    %144 = math.tanh %143 : vector<1x128xf32>
    %145 = arith.mulf %140, %144 : vector<1x128xf32>
    %c5_i32 = arith.constant 5 : i32
    %c0_58 = arith.constant 0 : index
    %c0_59 = arith.constant 0 : index
    %146 = vector.load %arg2[%c0_58, %c0_59] : memref<128x512xf32, #tpu.memory_space<vmem>>, vector<128x512xf32>
    %cst_60 = arith.constant dense<0.000000e+00> : vector<1x512xf32>
    %147 = tpu.matmul %145, %146, %cst_60 {dimension_numbers = #tpu.dot_dimension_numbers<[1], [0], [0], [1], [0, 0, 1, 1], [], []>} : vector<1x128xf32>, vector<128x512xf32>, vector<1x512xf32> -> vector<1x512xf32>
    %148 = arith.index_cast %c5_i32 : i32 to index
    %c0_61 = arith.constant 0 : index
    %149 = vector.load %arg7[%148, %c0_61] : memref<8x512xf32, #tpu.memory_space<vmem>>, vector<1x512xf32>
    %150 = arith.addf %149, %147 : vector<1x512xf32>
    %151 = math.tanh %150 : vector<1x512xf32>
    %152 = vector.extract_strided_slice %151 {offsets = [0, 0], sizes = [1, 128], strides = [1, 1]} : vector<1x512xf32> to vector<1x128xf32>
    %cst_62 = arith.constant 5.000000e-01 : f32
    %153 = vector.broadcast %cst_62 : f32 to vector<1x128xf32>
    %154 = arith.mulf %152, %153 : vector<1x128xf32>
    %cst_63 = arith.constant 5.000000e-01 : f32
    %155 = vector.broadcast %cst_63 : f32 to vector<1x128xf32>
    %156 = arith.addf %154, %155 : vector<1x128xf32>
    %157 = vector.extract_strided_slice %151 {offsets = [0, 128], sizes = [1, 128], strides = [1, 1]} : vector<1x512xf32> to vector<1x128xf32>
    %cst_64 = arith.constant 5.000000e-01 : f32
    %158 = vector.broadcast %cst_64 : f32 to vector<1x128xf32>
    %159 = arith.mulf %157, %158 : vector<1x128xf32>
    %cst_65 = arith.constant 5.000000e-01 : f32
    %160 = vector.broadcast %cst_65 : f32 to vector<1x128xf32>
    %161 = arith.addf %159, %160 : vector<1x128xf32>
    %162 = vector.extract_strided_slice %151 {offsets = [0, 256], sizes = [1, 128], strides = [1, 1]} : vector<1x512xf32> to vector<1x128xf32>
    %163 = vector.extract_strided_slice %151 {offsets = [0, 384], sizes = [1, 128], strides = [1, 1]} : vector<1x512xf32> to vector<1x128xf32>
    %cst_66 = arith.constant 5.000000e-01 : f32
    %164 = vector.broadcast %cst_66 : f32 to vector<1x128xf32>
    %165 = arith.mulf %163, %164 : vector<1x128xf32>
    %cst_67 = arith.constant 5.000000e-01 : f32
    %166 = vector.broadcast %cst_67 : f32 to vector<1x128xf32>
    %167 = arith.addf %165, %166 : vector<1x128xf32>
    %168 = arith.mulf %161, %143 : vector<1x128xf32>
    %169 = arith.mulf %156, %162 : vector<1x128xf32>
    %170 = arith.addf %168, %169 : vector<1x128xf32>
    %171 = math.tanh %170 : vector<1x128xf32>
    %172 = arith.mulf %167, %171 : vector<1x128xf32>
    %c6_i32 = arith.constant 6 : i32
    %c0_68 = arith.constant 0 : index
    %c0_69 = arith.constant 0 : index
    %173 = vector.load %arg2[%c0_68, %c0_69] : memref<128x512xf32, #tpu.memory_space<vmem>>, vector<128x512xf32>
    %cst_70 = arith.constant dense<0.000000e+00> : vector<1x512xf32>
    %174 = tpu.matmul %172, %173, %cst_70 {dimension_numbers = #tpu.dot_dimension_numbers<[1], [0], [0], [1], [0, 0, 1, 1], [], []>} : vector<1x128xf32>, vector<128x512xf32>, vector<1x512xf32> -> vector<1x512xf32>
    %175 = arith.index_cast %c6_i32 : i32 to index
    %c0_71 = arith.constant 0 : index
    %176 = vector.load %arg7[%175, %c0_71] : memref<8x512xf32, #tpu.memory_space<vmem>>, vector<1x512xf32>
    %177 = arith.addf %176, %174 : vector<1x512xf32>
    %178 = math.tanh %177 : vector<1x512xf32>
    %179 = vector.extract_strided_slice %178 {offsets = [0, 0], sizes = [1, 128], strides = [1, 1]} : vector<1x512xf32> to vector<1x128xf32>
    %cst_72 = arith.constant 5.000000e-01 : f32
    %180 = vector.broadcast %cst_72 : f32 to vector<1x128xf32>
    %181 = arith.mulf %179, %180 : vector<1x128xf32>
    %cst_73 = arith.constant 5.000000e-01 : f32
    %182 = vector.broadcast %cst_73 : f32 to vector<1x128xf32>
    %183 = arith.addf %181, %182 : vector<1x128xf32>
    %184 = vector.extract_strided_slice %178 {offsets = [0, 128], sizes = [1, 128], strides = [1, 1]} : vector<1x512xf32> to vector<1x128xf32>
    %cst_74 = arith.constant 5.000000e-01 : f32
    %185 = vector.broadcast %cst_74 : f32 to vector<1x128xf32>
    %186 = arith.mulf %184, %185 : vector<1x128xf32>
    %cst_75 = arith.constant 5.000000e-01 : f32
    %187 = vector.broadcast %cst_75 : f32 to vector<1x128xf32>
    %188 = arith.addf %186, %187 : vector<1x128xf32>
    %189 = vector.extract_strided_slice %178 {offsets = [0, 256], sizes = [1, 128], strides = [1, 1]} : vector<1x512xf32> to vector<1x128xf32>
    %190 = vector.extract_strided_slice %178 {offsets = [0, 384], sizes = [1, 128], strides = [1, 1]} : vector<1x512xf32> to vector<1x128xf32>
    %cst_76 = arith.constant 5.000000e-01 : f32
    %191 = vector.broadcast %cst_76 : f32 to vector<1x128xf32>
    %192 = arith.mulf %190, %191 : vector<1x128xf32>
    %cst_77 = arith.constant 5.000000e-01 : f32
    %193 = vector.broadcast %cst_77 : f32 to vector<1x128xf32>
    %194 = arith.addf %192, %193 : vector<1x128xf32>
    %195 = arith.mulf %188, %170 : vector<1x128xf32>
    %196 = arith.mulf %183, %189 : vector<1x128xf32>
    %197 = arith.addf %195, %196 : vector<1x128xf32>
    %198 = math.tanh %197 : vector<1x128xf32>
    %199 = arith.mulf %194, %198 : vector<1x128xf32>
    %c7_i32 = arith.constant 7 : i32
    %c0_78 = arith.constant 0 : index
    %c0_79 = arith.constant 0 : index
    %200 = vector.load %arg2[%c0_78, %c0_79] : memref<128x512xf32, #tpu.memory_space<vmem>>, vector<128x512xf32>
    %cst_80 = arith.constant dense<0.000000e+00> : vector<1x512xf32>
    %201 = tpu.matmul %199, %200, %cst_80 {dimension_numbers = #tpu.dot_dimension_numbers<[1], [0], [0], [1], [0, 0, 1, 1], [], []>} : vector<1x128xf32>, vector<128x512xf32>, vector<1x512xf32> -> vector<1x512xf32>
    %202 = arith.index_cast %c7_i32 : i32 to index
    %c0_81 = arith.constant 0 : index
    %203 = vector.load %arg7[%202, %c0_81] : memref<8x512xf32, #tpu.memory_space<vmem>>, vector<1x512xf32>
    %204 = arith.addf %203, %201 : vector<1x512xf32>
    %205 = math.tanh %204 : vector<1x512xf32>
    %206 = vector.extract_strided_slice %205 {offsets = [0, 0], sizes = [1, 128], strides = [1, 1]} : vector<1x512xf32> to vector<1x128xf32>
    %cst_82 = arith.constant 5.000000e-01 : f32
    %207 = vector.broadcast %cst_82 : f32 to vector<1x128xf32>
    %208 = arith.mulf %206, %207 : vector<1x128xf32>
    %cst_83 = arith.constant 5.000000e-01 : f32
    %209 = vector.broadcast %cst_83 : f32 to vector<1x128xf32>
    %210 = arith.addf %208, %209 : vector<1x128xf32>
    %211 = vector.extract_strided_slice %205 {offsets = [0, 128], sizes = [1, 128], strides = [1, 1]} : vector<1x512xf32> to vector<1x128xf32>
    %cst_84 = arith.constant 5.000000e-01 : f32
    %212 = vector.broadcast %cst_84 : f32 to vector<1x128xf32>
    %213 = arith.mulf %211, %212 : vector<1x128xf32>
    %cst_85 = arith.constant 5.000000e-01 : f32
    %214 = vector.broadcast %cst_85 : f32 to vector<1x128xf32>
    %215 = arith.addf %213, %214 : vector<1x128xf32>
    %216 = vector.extract_strided_slice %205 {offsets = [0, 256], sizes = [1, 128], strides = [1, 1]} : vector<1x512xf32> to vector<1x128xf32>
    %217 = vector.extract_strided_slice %205 {offsets = [0, 384], sizes = [1, 128], strides = [1, 1]} : vector<1x512xf32> to vector<1x128xf32>
    %cst_86 = arith.constant 5.000000e-01 : f32
    %218 = vector.broadcast %cst_86 : f32 to vector<1x128xf32>
    %219 = arith.mulf %217, %218 : vector<1x128xf32>
    %cst_87 = arith.constant 5.000000e-01 : f32
    %220 = vector.broadcast %cst_87 : f32 to vector<1x128xf32>
    %221 = arith.addf %219, %220 : vector<1x128xf32>
    %222 = arith.mulf %215, %197 : vector<1x128xf32>
    %223 = arith.mulf %210, %216 : vector<1x128xf32>
    %224 = arith.addf %222, %223 : vector<1x128xf32>
    %225 = math.tanh %224 : vector<1x128xf32>
    %226 = arith.mulf %221, %225 : vector<1x128xf32>
    %c8_i32 = arith.constant 8 : i32
    %c0_88 = arith.constant 0 : index
    %c0_89 = arith.constant 0 : index
    %227 = vector.load %arg4[%c0_88, %c0_89] : memref<128x128xf32, #tpu.memory_space<vmem>>, vector<128x128xf32>
    %cst_90 = arith.constant dense<0.000000e+00> : vector<1x128xf32>
    %228 = tpu.matmul %226, %227, %cst_90 {dimension_numbers = #tpu.dot_dimension_numbers<[1], [0], [0], [1], [0, 0, 1, 1], [], []>} : vector<1x128xf32>, vector<128x128xf32>, vector<1x128xf32> -> vector<1x128xf32>
    %c0_91 = arith.constant 0 : index
    %c0_92 = arith.constant 0 : index
    %229 = vector.load %arg5[%c0_91, %c0_92] : memref<1x128xf32, #tpu.memory_space<vmem>>, vector<1x128xf32>
    %230 = arith.addf %228, %229 : vector<1x128xf32>
    %c0_93 = arith.constant 0 : index
    %c0_94 = arith.constant 0 : index
    %231 = vector.load %arg6[%c0_93, %c0_94] : memref<1x128xf32, #tpu.memory_space<vmem>>, vector<1x128xf32>
    tpu.vector_store %arg6[%c0_93, %c0_94], %230 {strides = array<i32>} : memref<1x128xf32, #tpu.memory_space<vmem>>, vector<1x128xf32>,
    return
  }
}

</mosaic_0001>

<bundles_post_ra>
// kernel: tpu_custom_call.1
= control target key start
LH: loop header
LB: loop body
LE: loop exit
PB: predicated region body
PF: predicated region fallthrough
CT: control target
= control target key end

     0   :  { %11 = vsyncpa [#allocation4], 0  ;;  %s2181_s0 = inlined_call_operand.vmem [shape: f32[8,1], index: 0, kind: input, shape index: {}]   ;;  %s2182_s1 = inlined_call_operand.vmem [shape: f32[1,512], index: 1, kind: input, shape index: {}]   ;;  %s2183_s2 = inlined_call_operand.hbm [shape: f32[128,512], index: 2, kind: input, shape index: {}]   ;;  %s2184_s3 = inlined_call_operand.vmem [shape: f32[1,512], index: 3, kind: input, shape index: {}]   ;;  %s2185_s4 = inlined_call_operand.hbm [shape: f32[128,128], index: 4, kind: input, shape index: {}]   ;;  %s2186_s5 = inlined_call_operand.vmem [shape: f32[1,128], index: 5, kind: input, shape index: {}]   ;;  %s2187_s6 = inlined_call_operand.hbm [shape: f32[1,128], index: 6, kind: output, shape index: {}]  }
   0x1   :  { %12 = vsyncpa [#allocation7], 0 }
   0x2   :  { %13 = vsyncpa [#allocation5], 0  ;;  %s22_s23 = sshll.u32 %s2183_s2, 4  ;;  %s1304_s24 = smov [#allocation3]   ;;  %s23_s23 = int_to_ptr.hbm [resolvable:$true] %s22_s23 }
   0x3   :  { %s24_s25 = sshll.u32 %s1304_s24, 4  ;;  %s37_s28 = sshll.u32 %s2185_s4, 4  ;;  %s25_s25 = int_to_ptr.vmem [resolvable:$true] %s24_s25  ;;  %s38_s28 = int_to_ptr.hbm [resolvable:$true] %s37_s28 }
   0x4   :  { %s1305_s29 = smov 512   ;;  %s1306_s30 = smov 32  }
   0x5   :  { %30 = dma.hbm_to_vmem [thread:$0]  %s23_s23, 8192, %s25_s25, [#allocation4], %s1305_s29, %s1305_s29, %s1306_s30  }
   0x6   :  { %s1307_s7 = smov [#allocation6]   ;;  %s1308_s9 = smov 128  }
   0x7   :  { %s39_s8 = sshll.u32 %s1307_s7, 4  ;;  %s1309_s10 = smov 8   ;;  %s40_s8 = int_to_ptr.vmem [resolvable:$true] %s39_s8 }
   0x8   :  { %45 = dma.hbm_to_vmem [thread:$0]  %s38_s28, 2048, %s40_s8, [#allocation7], %s1308_s9, %s1308_s9, %s1309_s10  }
   0x9   :  { %1298 = dma.done.wait [#allocation4], 8192  }
   0xa   :  { %1299 = vsyncadd [#allocation4], 4294959104 }
   0xb   :  { %1300 = dma.done.wait [#allocation7], 2048  }
   0xc   :  { %1301 = vsyncadd [#allocation7], 4294965248  ;;  %v1354_v0 = vld [vmem:[#allocation3 + $0x1f0] sm:$0xff]  ;;  %v1356_v1 = vld [vmem:[#allocation3 + $0x1f8] sm:$0xff]  ;;  %v1310_v62 = vmov 0.0   ;;  %vm246_vm0 = vcmask 1040384  }
   0xd   :  { %v1358_v2 = vld [vmem:[#allocation3 + $0x1d0] sm:$0xff]  ;;  %198 = vmatpush.msra.mxu2 %v1354_v0  ;;  %218 = vmatpush.msra.mxu3 %v1356_v1  ;;  %v1362_v3 = vld [vmem:[#allocation3 + $0x1d8] sm:$0xff]  ;;  %v1368_v6 = vld [vmem:[#allocation3 + $0x1e8] sm:$0xff]  ;;  %vm248_vm1 = vcmask 1042434   ;;  %vm250_vm2 = vcmask 1041408   ;;  %s1312_s14 = smov [#allocation8]  }
   0xe   :  { %v1364_v4 = vld [vmem:[#allocation3 + $0x1b0] sm:$0xff]  ;;  %v1366_v5 = vld [vmem:[#allocation3 + $0x1b8] sm:$0xff]  ;;  %v1372_v7 = vld [vmem:[#allocation3 + $0x1e0] sm:$0xff]  ;;  %178 = vmatpush.msra.mxu1 %v1368_v6  ;;  %s1107_s15 = sshll.u32 %s1312_s14, 4  ;;  %s1109_s18 = sshll.u32 %s2187_s6, 4  ;;  %s1108_s15 = int_to_ptr.vmem [resolvable:$true] %s1107_s15  ;;  %s1110_s18 = int_to_ptr.hbm [resolvable:$true] %s1109_s18 }
   0xf   :  { %199 = vmatpush.msra.mxu2 %v1358_v2  ;;  %219 = vmatpush.msra.mxu3 %v1362_v3  ;;  %v1374_v8 = vld [vmem:[#allocation3 + $0x1c8] sm:$0xff]  ;;  %v1377_v9 = vld [vmem:[#allocation3 + $0x190] sm:$0xff]  ;;  %v1379_v10 = vld [vmem:[#allocation3 + $0x198] sm:$0xff] }
  0x10   :  { %158 = vmatpush.msra.mxu0 %v1372_v7  ;;  %v1382_v11 = vld [vmem:[#allocation3 + $0x1c0] sm:$0xff]  ;;  %v1386_v12 = vld [vmem:[#allocation3 + $0x1a8] sm:$0xff]  ;;  %179 = vmatpush.msra.mxu1 %v1374_v8  ;;  %v1391_v14 = vld [vmem:[#allocation3 + $0x170] sm:$0xff] }
  0x11   :  { %200 = vmatpush.msra.mxu2 %v1364_v4  ;;  %220 = vmatpush.msra.mxu3 %v1366_v5  ;;  %v1388_v13 = vld [vmem:[#allocation3 + $0x1a0] sm:$0xff]  ;;  %v1393_v15 = vld [vmem:[#allocation3 + $0x178] sm:$0xff]  ;;  %v1398_v16 = vld [vmem:[#allocation3 + $0x188] sm:$0xff] }
  0x12   :  { %159 = vmatpush.msra.mxu0 %v1382_v11  ;;  %v1400_v17 = vld [vmem:[#allocation3 + $0x180] sm:$0xff]  ;;  %180 = vmatpush.msra.mxu1 %v1386_v12  ;;  %v1403_v18 = vld [vmem:[#allocation3 + $0x150] sm:$0xff]  ;;  %v1405_v19 = vld [vmem:[#allocation3 + $0x158] sm:$0xff] }
  0x13   :  { %201 = vmatpush.msra.mxu2 %v1377_v9  ;;  %221 = vmatpush.msra.mxu3 %v1379_v10  ;;  %v1410_v20 = vld [vmem:[#allocation3 + $0x168] sm:$0xff]  ;;  %v1412_v21 = vld [vmem:[#allocation3 + $0x160] sm:$0xff]  ;;  %v1415_v22 = vld [vmem:[#allocation3 + $0x130] sm:$0xff] }
  0x14   :  { %160 = vmatpush.msra.mxu0 %v1388_v13  ;;  %181 = vmatpush.msra.mxu1 %v1398_v16  ;;  %v1417_v23 = vld [vmem:[#allocation3 + $0x138] sm:$0xff]  ;;  %v1422_v24 = vld [vmem:[#allocation3 + $0x148] sm:$0xff]  ;;  %v1424_v25 = vld [vmem:[#allocation3 + $0x140] sm:$0xff] }
  0x15   :  { %202 = vmatpush.msra.mxu2 %v1391_v14  ;;  %222 = vmatpush.msra.mxu3 %v1393_v15  ;;  %v1427_v26 = vld [vmem:[#allocation3 + $0x110] sm:$0xff]  ;;  %v1429_v27 = vld [vmem:[#allocation3 + $0x118] sm:$0xff]  ;;  %v1434_v28 = vld [vmem:[#allocation3 + $0x128] sm:$0xff] }
  0x16   :  { %161 = vmatpush.msra.mxu0 %v1400_v17  ;;  %182 = vmatpush.msra.mxu1 %v1410_v20  ;;  %v1436_v29 = vld [vmem:[#allocation3 + $0x120] sm:$0xff]  ;;  %v1439_v30 = vld [vmem:[#allocation3 + $0xf0] sm:$0xff]  ;;  %v1441_v31 = vld [vmem:[#allocation3 + $0xf8] sm:$0xff] }
  0x17   :  { %203 = vmatpush.msra.mxu2 %v1403_v18  ;;  %223 = vmatpush.msra.mxu3 %v1405_v19  ;;  %v1446_v32 = vld [vmem:[#allocation3 + $0x108] sm:$0xff]  ;;  %v1448_v33 = vld [vmem:[#allocation3 + $0x100] sm:$0xff]  ;;  %v1451_v34 = vld [vmem:[#allocation3 + $0xd0] sm:$0xff] }
  0x18   :  { %162 = vmatpush.msra.mxu0 %v1412_v21  ;;  %183 = vmatpush.msra.mxu1 %v1422_v24  ;;  %v1453_v35 = vld [vmem:[#allocation3 + $0xd8] sm:$0xff]  ;;  %v1458_v36 = vld [vmem:[#allocation3 + $0xe8] sm:$0xff]  ;;  %v1460_v37 = vld [vmem:[#allocation3 + $0xe0] sm:$0xff] }
  0x19   :  { %204 = vmatpush.msra.mxu2 %v1415_v22  ;;  %224 = vmatpush.msra.mxu3 %v1417_v23  ;;  %v1463_v38 = vld [vmem:[#allocation3 + $0xb0] sm:$0xff]  ;;  %v1465_v39 = vld [vmem:[#allocation3 + $0xb8] sm:$0xff]  ;;  %v1470_v40 = vld [vmem:[#allocation3 + $0xc8] sm:$0xff] }
  0x1a   :  { %163 = vmatpush.msra.mxu0 %v1424_v25  ;;  %184 = vmatpush.msra.mxu1 %v1434_v28  ;;  %2258 = vst [vmem:[#allocation12_spill] sm:$0xff] %v1463_v38  ;;  %v1472_v41 = vld [vmem:[#allocation3 + $0xc0] sm:$0xff]  ;;  %v1475_v42 = vld [vmem:[#allocation3 + $0x90] sm:$0xff]  ;;  %v1477_v43 = vld [vmem:[#allocation3 + $0x98] sm:$0xff] }
  0x1b   :  { %205 = vmatpush.msra.mxu2 %v1427_v26  ;;  %225 = vmatpush.msra.mxu3 %v1429_v27  ;;  %2259 = vst [vmem:[#allocation13_spill] sm:$0xff] %v1465_v39  ;;  %v1482_v44 = vld [vmem:[#allocation3 + $0xa8] sm:$0xff]  ;;  %v1484_v45 = vld [vmem:[#allocation3 + $0xa0] sm:$0xff]  ;;  %v1487_v46 = vld [vmem:[#allocation3 + $0x70] sm:$0xff] }
  0x1c   :  { %164 = vmatpush.msra.mxu0 %v1436_v29  ;;  %185 = vmatpush.msra.mxu1 %v1446_v32  ;;  %2260 = vst [vmem:[#allocation14_spill] sm:$0xff] %v1475_v42  ;;  %v1489_v47 = vld [vmem:[#allocation3 + $0x78] sm:$0xff]  ;;  %v1494_v48 = vld [vmem:[#allocation3 + $0x88] sm:$0xff]  ;;  %v1496_v49 = vld [vmem:[#allocation3 + $0x80] sm:$0xff] }
  0x1d   :  { %206 = vmatpush.msra.mxu2 %v1439_v30  ;;  %226 = vmatpush.msra.mxu3 %v1441_v31  ;;  %2261 = vst [vmem:[#allocation15_spill] sm:$0xff] %v1477_v43  ;;  %v1499_v50 = vld [vmem:[#allocation3 + $0x50] sm:$0xff]  ;;  %v1501_v51 = vld [vmem:[#allocation3 + $0x58] sm:$0xff]  ;;  %v1506_v52 = vld [vmem:[#allocation3 + $0x68] sm:$0xff] }
  0x1e   :  { %165 = vmatpush.msra.mxu0 %v1448_v33  ;;  %186 = vmatpush.msra.mxu1 %v1458_v36  ;;  %2262 = vst [vmem:[#allocation16_spill] sm:$0xff] %v1482_v44  ;;  %v1508_v53 = vld [vmem:[#allocation3 + $0x60] sm:$0xff]  ;;  %v1511_v54 = vld [vmem:[#allocation3 + $0x30] sm:$0xff]  ;;  %v1513_v55 = vld [vmem:[#allocation3 + $0x38] sm:$0xff] }
  0x1f   :  { %207 = vmatpush.msra.mxu2 %v1451_v34  ;;  %227 = vmatpush.msra.mxu3 %v1453_v35  ;;  %2263 = vst [vmem:[#allocation17_spill] sm:$0xff] %v1487_v46  ;;  %v1518_v56 = vld [vmem:[#allocation3 + $0x48] sm:$0xff]  ;;  %v1520_v57 = vld [vmem:[#allocation3 + $0x40] sm:$0xff]  ;;  %v1523_v58 = vld [vmem:[#allocation3 + $0x10] sm:$0xff] }
  0x20   :  { %166 = vmatpush.msra.mxu0 %v1460_v37  ;;  %187 = vmatpush.msra.mxu1 %v1470_v40  ;;  %2264 = vst [vmem:[#allocation18_spill] sm:$0xff] %v1489_v47  ;;  %v1525_v59 = vld [vmem:[#allocation3 + $0x18] sm:$0xff]  ;;  %v1532_v60 = vld [vmem:[#allocation3 + $0x28] sm:$0xff]  ;;  %v1534_v61 = vld [vmem:[#allocation3 + $0x20] sm:$0xff] }
  0x21   :  { %208 = vmatpush.msra.mxu2 %v1463_v38  ;;  %228 = vmatpush.msra.mxu3 %v1465_v39  ;;  %2265 = vst [vmem:[#allocation19_spill] sm:$0xff] %v1494_v48  ;;  %v1538_v63 = vld [vmem:[#allocation3 + $0x8] sm:$0xff] }
  0x22   :  { %167 = vmatpush.msra.mxu0 %v1472_v41  ;;  %2266 = vst [vmem:[#allocation20_spill] sm:$0xff] %v1496_v49  ;;  %188 = vmatpush.msra.mxu1 %v1482_v44 }
  0x23   :  { %209 = vmatpush.msra.mxu2 %v1475_v42  ;;  %229 = vmatpush.msra.mxu3 %v1477_v43  ;;  %2267 = vst [vmem:[#allocation21_spill] sm:$0xff] %v1499_v50 }
  0x24   :  { %2268 = vst [vmem:[#allocation22_spill] sm:$0xff] %v1501_v51  ;;  %168 = vmatpush.msra.mxu0 %v1484_v45  ;;  %189 = vmatpush.msra.mxu1 %v1494_v48 }
  0x25   :  { %210 = vmatpush.msra.mxu2 %v1487_v46  ;;  %230 = vmatpush.msra.mxu3 %v1489_v47  ;;  %2269 = vst [vmem:[#allocation23_spill] sm:$0xff] %v1506_v52 }
  0x26   :  { %2270 = vst [vmem:[#allocation24_spill] sm:$0xff] %v1508_v53  ;;  %169 = vmatpush.msra.mxu0 %v1496_v49  ;;  %190 = vmatpush.msra.mxu1 %v1506_v52 }
  0x27   :  { %2271 = vst [vmem:[#allocation25_spill] sm:$0xff] %v1511_v54  ;;  %211 = vmatpush.msra.mxu2 %v1499_v50  ;;  %231 = vmatpush.msra.mxu3 %v1501_v51  ;;  %v56_v51 = vld [vmem:[%s2181_s0] sm:$0xff] }
  0x28   :  { %2272 = vst [vmem:[#allocation26_spill] sm:$0xff] %v1513_v55  ;;  %170 = vmatpush.msra.mxu0 %v1508_v53  ;;  %191 = vmatpush.msra.mxu1 %v1518_v56 }
  0x29   :  { %2273 = vst [vmem:[#allocation27_spill] sm:$0xff] %v1518_v56  ;;  %212 = vmatpush.msra.mxu2 %v1511_v54  ;;  %232 = vmatpush.msra.mxu3 %v1513_v55  ;;  %v1540_v54 = vld [vmem:[#allocation3] sm:$0xff]  ;;  %v1311_v55 = vmov 0  }
  0x2a   :  { %2274 = vst [vmem:[#allocation28_spill] sm:$0xff] %v1520_v57  ;;  %171 = vmatpush.msra.mxu0 %v1520_v57  ;;  %192 = vmatpush.msra.mxu1 %v1532_v60 }
  0x2b   :  { %2275 = vst [vmem:[#allocation29_spill] sm:$0xff] %v1523_v58  ;;  %213 = vmatpush.msra.mxu2 %v1523_v58  ;;  %233 = vmatpush.msra.mxu3 %v1525_v59 }
  0x2c   :  { %2276 = vst [vmem:[#allocation30_spill] sm:$0xff] %v1525_v59  ;;  %214 = vmatmul.f32.vlgmr.msra.gmra.mxu2 %v1310_v62  ;;  %234 = vmatmul.f32.vlgmr.msra.gmra.mxu3 %v1310_v62 }
  0x2d   :  { %2277 = vst [vmem:[#allocation31_spill] sm:$0xff] %v1532_v60  ;;  %172 = vmatpush.msra.mxu0 %v1534_v61  ;;  %1129 = vset.pattern.permute.xlu0 %v1311_v55 }
  0x2e   :  { %2278 = vst [vmem:[#allocation32_spill] sm:$0xff] %v1534_v61  ;;  %313 = vmatpush.msrb.mxu2 %v1354_v0  ;;  %193 = vmatpush.msra.mxu1 %v1538_v63  ;;  %v2282_v55 = vld [vmem:[#allocation25_spill] sm:$0xff] }
  0x2f   :  { %2279 = vst [vmem:[#allocation33_spill] sm:$0xff] %v1538_v63  ;;  %173 = vmatpush.msra.mxu0 %v1540_v54  ;;  %194 = vmatmul.f32.vlgmr.msra.gmra.mxu1 %v1310_v62 }
  0x30   :  { %2280 = vst [vmem:[#allocation34_spill] sm:$0xff] %v1540_v54  ;;  %174 = vmatmul.f32.vlgmr.msra.gmra.mxu0 %v1310_v62  ;;  %60 = vperm.xlu0 %1129, %v56_v51   ;;  %v2281_v51 = vld [vmem:[#allocation22_spill] sm:$0xff] }
  0x31   :  { %273 = vmatpush.msrb.mxu0 %v1372_v7  ;;  %293 = vmatpush.msrb.mxu1 %v1368_v6  ;;  %v2283_v62 = vld [vmem:[#allocation26_spill] sm:$0xff] }
  0x32   :  { %333 = vmatpush.msrb.mxu3 %v1356_v1  ;;  %314 = vmatpush.msrb.mxu2 %v1358_v2 }
  0x33   :  { %274 = vmatpush.msrb.mxu0 %v1382_v11  ;;  %294 = vmatpush.msrb.mxu1 %v1374_v8 }
  0x34   :  { %334 = vmatpush.msrb.mxu3 %v1362_v3  ;;  %315 = vmatpush.msrb.mxu2 %v1364_v4 }
  0x35   :  { %275 = vmatpush.msrb.mxu0 %v1388_v13  ;;  %295 = vmatpush.msrb.mxu1 %v1386_v12 }
  0x36   :  { %335 = vmatpush.msrb.mxu3 %v1366_v5  ;;  %316 = vmatpush.msrb.mxu2 %v1377_v9 }
  0x37   :  { %276 = vmatpush.msrb.mxu0 %v1400_v17  ;;  %296 = vmatpush.msrb.mxu1 %v1398_v16 }
  0x38   :  { %336 = vmatpush.msrb.mxu3 %v1379_v10  ;;  %317 = vmatpush.msrb.mxu2 %v1391_v14 }
  0x39   :  { %277 = vmatpush.msrb.mxu0 %v1412_v21  ;;  %297 = vmatpush.msrb.mxu1 %v1410_v20 }
  0x3a   :  { %337 = vmatpush.msrb.mxu3 %v1393_v15  ;;  %318 = vmatpush.msrb.mxu2 %v1403_v18 }
  0x3b   :  { %278 = vmatpush.msrb.mxu0 %v1424_v25  ;;  %298 = vmatpush.msrb.mxu1 %v1422_v24 }
  0x3c   :  { %338 = vmatpush.msrb.mxu3 %v1405_v19  ;;  %319 = vmatpush.msrb.mxu2 %v1415_v22 }
  0x3d   :  { %279 = vmatpush.msrb.mxu0 %v1436_v29  ;;  %299 = vmatpush.msrb.mxu1 %v1434_v28 }
  0x3e   :  { %339 = vmatpush.msrb.mxu3 %v1417_v23  ;;  %320 = vmatpush.msrb.mxu2 %v1427_v26 }
  0x3f   :  { %280 = vmatpush.msrb.mxu0 %v1448_v33  ;;  %300 = vmatpush.msrb.mxu1 %v1446_v32 }
  0x40   :  { %340 = vmatpush.msrb.mxu3 %v1429_v27  ;;  %321 = vmatpush.msrb.mxu2 %v1439_v30 }
  0x41   :  { %281 = vmatpush.msrb.mxu0 %v1460_v37  ;;  %301 = vmatpush.msrb.mxu1 %v1458_v36 }
  0x42   :  { %341 = vmatpush.msrb.mxu3 %v1441_v31  ;;  %322 = vmatpush.msrb.mxu2 %v1451_v34 }
  0x43   :  { %282 = vmatpush.msrb.mxu0 %v1472_v41  ;;  %302 = vmatpush.msrb.mxu1 %v1470_v40 }
  0x44   :  { %342 = vmatpush.msrb.mxu3 %v1453_v35  ;;  %323 = vmatpush.msrb.mxu2 %v1463_v38 }
  0x45   :  { %283 = vmatpush.msrb.mxu0 %v1484_v45  ;;  %303 = vmatpush.msrb.mxu1 %v1482_v44 }
  0x46   :  { %343 = vmatpush.msrb.mxu3 %v1465_v39  ;;  %324 = vmatpush.msrb.mxu2 %v1475_v42 }
  0x47   :  { %284 = vmatpush.msrb.mxu0 %v1496_v49  ;;  %304 = vmatpush.msrb.mxu1 %v1494_v48 }
  0x48   :  { %344 = vmatpush.msrb.mxu3 %v1477_v43  ;;  %325 = vmatpush.msrb.mxu2 %v1487_v46 }
  0x49   :  { %285 = vmatpush.msrb.mxu0 %v1508_v53  ;;  %305 = vmatpush.msrb.mxu1 %v1506_v52 }
  0x4a   :  { %345 = vmatpush.msrb.mxu3 %v1489_v47  ;;  %326 = vmatpush.msrb.mxu2 %v1499_v50 }
  0x4b   :  { %286 = vmatpush.msrb.mxu0 %v1520_v57  ;;  %306 = vmatpush.msrb.mxu1 %v1518_v56 }
  0x4c   :  { %346 = vmatpush.msrb.mxu3 %v2281_v51  ;;  %327 = vmatpush.msrb.mxu2 %v2282_v55 }
  0x4d   :  { %287 = vmatpush.msrb.mxu0 %v1534_v61  ;;  %307 = vmatpush.msrb.mxu1 %v1532_v60 }
  0x4e   :  { %347 = vmatpush.msrb.mxu3 %v2283_v62  ;;  %328 = vmatpush.msrb.mxu2 %v1523_v58 }
  0x4f   :  { %288 = vmatpush.msrb.mxu0 %v1540_v54  ;;  %308 = vmatpush.msrb.mxu1 %v1538_v63 }
  0x50   :  { %348 = vmatpush.msrb.mxu3 %v1525_v59  ;;  %426 = vmatpush.msra.mxu2 %v1354_v0 }
  0x51   :  { %386 = vmatpush.msra.mxu0 %v1372_v7  ;;  %406 = vmatpush.msra.mxu1 %v1368_v6 }
  0x52   :  { %446 = vmatpush.msra.mxu3 %v1356_v1  ;;  %427 = vmatpush.msra.mxu2 %v1358_v2 }
  0x53   :  { %387 = vmatpush.msra.mxu0 %v1382_v11  ;;  %407 = vmatpush.msra.mxu1 %v1374_v8 }
  0x54   :  { %447 = vmatpush.msra.mxu3 %v1362_v3  ;;  %428 = vmatpush.msra.mxu2 %v1364_v4 }
  0x55   :  { %388 = vmatpush.msra.mxu0 %v1388_v13  ;;  %408 = vmatpush.msra.mxu1 %v1386_v12 }
  0x56   :  { %448 = vmatpush.msra.mxu3 %v1366_v5  ;;  %429 = vmatpush.msra.mxu2 %v1377_v9 }
  0x57   :  { %389 = vmatpush.msra.mxu0 %v1400_v17  ;;  %409 = vmatpush.msra.mxu1 %v1398_v16 }
  0x58   :  { %449 = vmatpush.msra.mxu3 %v1379_v10  ;;  %430 = vmatpush.msra.mxu2 %v1391_v14 }
  0x59   :  { %390 = vmatpush.msra.mxu0 %v1412_v21  ;;  %410 = vmatpush.msra.mxu1 %v1410_v20 }
  0x5a   :  { %450 = vmatpush.msra.mxu3 %v1393_v15  ;;  %431 = vmatpush.msra.mxu2 %v1403_v18 }
  0x5b   :  { %391 = vmatpush.msra.mxu0 %v1424_v25  ;;  %411 = vmatpush.msra.mxu1 %v1422_v24 }
  0x5c   :  { %451 = vmatpush.msra.mxu3 %v1405_v19  ;;  %432 = vmatpush.msra.mxu2 %v1415_v22 }
  0x5d   :  { %392 = vmatpush.msra.mxu0 %v1436_v29  ;;  %412 = vmatpush.msra.mxu1 %v1434_v28 }
  0x5e   :  { %452 = vmatpush.msra.mxu3 %v1417_v23  ;;  %433 = vmatpush.msra.mxu2 %v1427_v26 }
  0x5f   :  { %393 = vmatpush.msra.mxu0 %v1448_v33  ;;  %413 = vmatpush.msra.mxu1 %v1446_v32 }
  0x60   :  { %453 = vmatpush.msra.mxu3 %v1429_v27  ;;  %434 = vmatpush.msra.mxu2 %v1439_v30 }
  0x61   :  { %394 = vmatpush.msra.mxu0 %v1460_v37  ;;  %414 = vmatpush.msra.mxu1 %v1458_v36 }
  0x62   :  { %454 = vmatpush.msra.mxu3 %v1441_v31  ;;  %435 = vmatpush.msra.mxu2 %v1451_v34 }
  0x63   :  { %395 = vmatpush.msra.mxu0 %v1472_v41  ;;  %415 = vmatpush.msra.mxu1 %v1470_v40 }
  0x64   :  { %455 = vmatpush.msra.mxu3 %v1453_v35  ;;  %436 = vmatpush.msra.mxu2 %v1463_v38 }
  0x65   :  { %396 = vmatpush.msra.mxu0 %v1484_v45  ;;  %416 = vmatpush.msra.mxu1 %v1482_v44 }
  0x66   :  { %456 = vmatpush.msra.mxu3 %v1465_v39  ;;  %437 = vmatpush.msra.mxu2 %v1475_v42 }
  0x67   :  { %397 = vmatpush.msra.mxu0 %v1496_v49  ;;  %417 = vmatpush.msra.mxu1 %v1494_v48 }
  0x68   :  { %457 = vmatpush.msra.mxu3 %v1477_v43  ;;  %438 = vmatpush.msra.mxu2 %v1487_v46 }
  0x69   :  { %398 = vmatpush.msra.mxu0 %v1508_v53  ;;  %418 = vmatpush.msra.mxu1 %v1506_v52 }
  0x6a   :  { %458 = vmatpush.msra.mxu3 %v1489_v47  ;;  %439 = vmatpush.msra.mxu2 %v1499_v50 }
  0x6b   :  { %399 = vmatpush.msra.mxu0 %v1520_v57  ;;  %419 = vmatpush.msra.mxu1 %v1518_v56 }
  0x6c   :  { %459 = vmatpush.msra.mxu3 %v2281_v51  ;;  %440 = vmatpush.msra.mxu2 %v2282_v55  ;;  %v57_v51 = vld [vmem:[%s2182_s1] sm:$0xf] }
  0x6d   :  { %400 = vmatpush.msra.mxu0 %v1534_v61  ;;  %420 = vmatpush.msra.mxu1 %v1532_v60  ;;  %v76_v60 = vld [vmem:[%s2184_s3] sm:$0xf]  ;;  %v64_v61 = vperm.slane %v57_v51, 0  ;;  %v65_v55 = vperm.slane %v57_v51, 1  ;;  %v66_v50 = vperm.slane %v57_v51, 2 }
  0x6e   :  { %460 = vmatpush.msra.mxu3 %v2283_v62  ;;  %441 = vmatpush.msra.mxu2 %v1523_v58  ;;  %v67_v62 = vperm.slane %v57_v51, 3  ;;  %v78_v56 = vperm.slane %v76_v60, 0  ;;  %v80_v57 = vperm.slane %v76_v60, 2 }
  0x6f   :  { %401 = vmatpush.msra.mxu0 %v1540_v54  ;;  %421 = vmatpush.msra.mxu1 %v1538_v63  ;;  %v79_v54 = vperm.slane %v76_v60, 1  ;;  %v81_v63 = vperm.slane %v76_v60, 3 }
  0x70   :  { %461 = vmatpush.msra.mxu3 %v1525_v59 }
  0xa2   :  { %v61_v47 = vpop.permute.xlu0 %60 }
  0xa3   :  { %v72_v58 = vmul.f32 %v64_v61, %v61_v47  ;;  %v73_v46 = vmul.f32 %v65_v55, %v61_v47  ;;  %v74_v59 = vmul.f32 %v66_v50, %v61_v47  ;;  %v75_v52 = vmul.f32 %v67_v62, %v61_v47 }
  0xa5   :  { %v86_v53 = vadd.f32 %v78_v56, %v72_v58  ;;  %v87_v43 = vadd.f32 %v79_v54, %v73_v46  ;;  %v88_v42 = vadd.f32 %v80_v57, %v74_v59  ;;  %v89_v48 = vadd.f32 %v81_v63, %v75_v52 }
  0xa7   :  { %90 = vst [vmem:[#allocation2] sm:$0xff] %v86_v53 }
  0xa8   :  { %91 = vst [vmem:[#allocation2 + $0x8] sm:$0xff] %v87_v43 }
  0xa9   :  { %92 = vst [vmem:[#allocation2 + $0x10] sm:$0xff] %v88_v42 }
  0xaa   :  { %93 = vst [vmem:[#allocation2 + $0x18] sm:$0xff] %v89_v48 }
  0xac   :  { %v195_v49 = vpop.f32.mrf.mxu1 }
  0xad   :  { %v175_v39 = vpop.f32.mrf.mxu0  ;;  %v243_v51 = vrot.slane %v195_v49, 7 }
  0xaf   :  { %v215_v38 = vpop.f32.mrf.mxu2  ;;  %v235_v44 = vpop.f32.mrf.mxu3  ;;  %v247_v50 = vsel %vm246_vm0, %v175_v39, %v243_v51  ;;  %v2284_v51 = vld [vmem:[#allocation16_spill] sm:$0xff] }
  0xb0   :  { %v244_v60 = vrot.slane %v215_v38, 6  ;;  %v245_v61 = vrot.slane %v235_v44, 5 }
  0xb1   :  { %v238_v47 = vld [vmem:[#allocation2] ss:$8 sm:$0xf] }
  0xb2   :  { %v249_v46 = vsel %vm248_vm1, %v244_v60, %v245_v61  ;;  %v2285_v60 = vld [vmem:[#allocation12_spill] sm:$0xff]  ;;  %v2286_v61 = vld [vmem:[#allocation13_spill] sm:$0xff] }
  0xb3   :  { %v251_v52 = vsel %vm250_vm2, %v247_v50, %v249_v46  ;;  %v2287_v50 = vld [vmem:[#allocation20_spill] sm:$0xff]  ;;  %v2288_v46 = vld [vmem:[#allocation19_spill] sm:$0xff] }
  0xb4   :  { %v253_v43 = vadd.f32 %v251_v52, %v238_v47  ;;  %v2289_v47 = vld [vmem:[#allocation14_spill] sm:$0xff]  ;;  %v2290_v52 = vld [vmem:[#allocation15_spill] sm:$0xff] }
  0xb6   :  { %1130 = vtanh.f32 %v253_v43  ;;  %v2291_v43 = vld [vmem:[#allocation24_spill] sm:$0xff] }
  0xbc   :  { %v1131_v42 = vpop.eup %1130 }
  0xbd   :  { %v255_v48 = vmul.f32 0.5, %v1131_v42  ;;  %v258_v53 = vrot.slane %v1131_v42, 1  ;;  %v267_v57 = vrot.slane %v1131_v42, 2  ;;  %v262_v44 = vrot.slane %v1131_v42, 3  ;;  %v2292_v42 = vld [vmem:[#allocation23_spill] sm:$0xff] }
  0xbf   :  { %v256_v54 = vadd.f32 0.5, %v255_v48  ;;  %v260_v49 = vmul.f32 0.5, %v258_v53  ;;  %v264_v39 = vmul.f32 0.5, %v262_v44  ;;  %v2293_v48 = vld [vmem:[#allocation17_spill] sm:$0xff]  ;;  %v2294_v53 = vld [vmem:[#allocation18_spill] sm:$0xff] }
  0xc0   :  { %v2301_v44 = vld [vmem:[#allocation25_spill] sm:$0xff] }
  0xc1   :  { %v261_v56 = vadd.f32 0.5, %v260_v49  ;;  %v269_v38 = vmul.f32 %v267_v57, %v256_v54  ;;  %v265_v63 = vadd.f32 0.5, %v264_v39  ;;  %v2295_v54 = vld [vmem:[#allocation28_spill] sm:$0xff]  ;;  %v2296_v49 = vld [vmem:[#allocation27_spill] sm:$0xff]  ;;  %v2298_v57 = vld [vmem:[#allocation22_spill] sm:$0xff] }
  0xc2   :  { %v2302_v39 = vld [vmem:[#allocation26_spill] sm:$0xff] }
  0xc3   :  { %v266_v58 = vmul.f32 0.0, %v261_v56  ;;  %v2297_v56 = vld [vmem:[#allocation21_spill] sm:$0xff] }
  0xc5   :  { %v1686_v59 = vadd.f32 %v269_v38, %v266_v58  ;;  %v2299_v58 = vld [vmem:[#allocation32_spill] sm:$0xff]  ;;  %v2300_v38 = vld [vmem:[#allocation31_spill] sm:$0xff] }
  0xc7   :  { %1132 = vtanh.f32 %v1686_v59 }
  0xcd   :  { %v1133_v55 = vpop.eup %1132 }
  0xce   :  { %v272_v62 = vmul.f32 %v1133_v55, %v265_v63  ;;  %v2303_v63 = vld [vmem:[#allocation34_spill] sm:$0xff]  ;;  %v2304_v55 = vld [vmem:[#allocation33_spill] sm:$0xff] }
  0xd0   :  { %289 = vmatmul.f32.vlgmr.msrb.gmra.mxu0 %v272_v62  ;;  %309 = vmatmul.f32.vlgmr.msrb.gmra.mxu1 %v272_v62 }
  0xd1   :  { %329 = vmatmul.f32.vlgmr.msrb.gmra.mxu2 %v272_v62  ;;  %349 = vmatmul.f32.vlgmr.msrb.gmra.mxu3 %v272_v62  ;;  %v2305_v62 = vld [vmem:[#allocation29_spill] sm:$0xff] }
  0xd2   :  { %499 = vmatpush.msrb.mxu0 %v1372_v7  ;;  %519 = vmatpush.msrb.mxu1 %v1368_v6 }
  0xd3   :  { %539 = vmatpush.msrb.mxu2 %v1354_v0  ;;  %559 = vmatpush.msrb.mxu3 %v1356_v1 }
  0xd4   :  { %500 = vmatpush.msrb.mxu0 %v1382_v11  ;;  %520 = vmatpush.msrb.mxu1 %v1374_v8 }
  0xd5   :  { %540 = vmatpush.msrb.mxu2 %v1358_v2  ;;  %560 = vmatpush.msrb.mxu3 %v1362_v3 }
  0xd6   :  { %501 = vmatpush.msrb.mxu0 %v1388_v13  ;;  %521 = vmatpush.msrb.mxu1 %v1386_v12 }
  0xd7   :  { %541 = vmatpush.msrb.mxu2 %v1364_v4  ;;  %561 = vmatpush.msrb.mxu3 %v1366_v5 }
  0xd8   :  { %502 = vmatpush.msrb.mxu0 %v1400_v17  ;;  %522 = vmatpush.msrb.mxu1 %v1398_v16 }
  0xd9   :  { %542 = vmatpush.msrb.mxu2 %v1377_v9  ;;  %562 = vmatpush.msrb.mxu3 %v1379_v10 }
  0xda   :  { %503 = vmatpush.msrb.mxu0 %v1412_v21  ;;  %523 = vmatpush.msrb.mxu1 %v1410_v20 }
  0xdb   :  { %543 = vmatpush.msrb.mxu2 %v1391_v14  ;;  %563 = vmatpush.msrb.mxu3 %v1393_v15 }
  0xdc   :  { %504 = vmatpush.msrb.mxu0 %v1424_v25  ;;  %524 = vmatpush.msrb.mxu1 %v1422_v24 }
  0xdd   :  { %544 = vmatpush.msrb.mxu2 %v1403_v18  ;;  %564 = vmatpush.msrb.mxu3 %v1405_v19 }
  0xde   :  { %505 = vmatpush.msrb.mxu0 %v1436_v29  ;;  %525 = vmatpush.msrb.mxu1 %v1434_v28 }
  0xdf   :  { %545 = vmatpush.msrb.mxu2 %v1415_v22  ;;  %565 = vmatpush.msrb.mxu3 %v1417_v23 }
  0xe0   :  { %506 = vmatpush.msrb.mxu0 %v1448_v33  ;;  %526 = vmatpush.msrb.mxu1 %v1446_v32 }
  0xe1   :  { %546 = vmatpush.msrb.mxu2 %v1427_v26  ;;  %566 = vmatpush.msrb.mxu3 %v1429_v27 }
  0xe2   :  { %507 = vmatpush.msrb.mxu0 %v1460_v37  ;;  %527 = vmatpush.msrb.mxu1 %v1458_v36 }
  0xe3   :  { %547 = vmatpush.msrb.mxu2 %v1439_v30  ;;  %567 = vmatpush.msrb.mxu3 %v1441_v31 }
  0xe4   :  { %508 = vmatpush.msrb.mxu0 %v1472_v41  ;;  %528 = vmatpush.msrb.mxu1 %v1470_v40 }
  0xe5   :  { %548 = vmatpush.msrb.mxu2 %v1451_v34  ;;  %568 = vmatpush.msrb.mxu3 %v1453_v35 }
  0xe6   :  { %509 = vmatpush.msrb.mxu0 %v1484_v45  ;;  %529 = vmatpush.msrb.mxu1 %v2284_v51 }
  0xe7   :  { %549 = vmatpush.msrb.mxu2 %v2285_v60  ;;  %569 = vmatpush.msrb.mxu3 %v2286_v61 }
  0xe8   :  { %510 = vmatpush.msrb.mxu0 %v2287_v50  ;;  %530 = vmatpush.msrb.mxu1 %v2288_v46 }
  0xe9   :  { %550 = vmatpush.msrb.mxu2 %v2289_v47  ;;  %570 = vmatpush.msrb.mxu3 %v2290_v52 }
  0xea   :  { %511 = vmatpush.msrb.mxu0 %v2291_v43  ;;  %531 = vmatpush.msrb.mxu1 %v2292_v42 }
  0xeb   :  { %551 = vmatpush.msrb.mxu2 %v2293_v48  ;;  %571 = vmatpush.msrb.mxu3 %v2294_v53 }
  0xec   :  { %512 = vmatpush.msrb.mxu0 %v2295_v54  ;;  %532 = vmatpush.msrb.mxu1 %v2296_v49  ;;  %v2306_v54 = vld [vmem:[#allocation30_spill] sm:$0xff] }
  0xed   :  { %552 = vmatpush.msrb.mxu2 %v2297_v56  ;;  %572 = vmatpush.msrb.mxu3 %v2298_v57 }
  0xee   :  { %513 = vmatpush.msrb.mxu0 %v2299_v58  ;;  %533 = vmatpush.msrb.mxu1 %v2300_v38 }
  0xef   :  { %553 = vmatpush.msrb.mxu2 %v2301_v44  ;;  %573 = vmatpush.msrb.mxu3 %v2302_v39  ;;  %v354_v39 = vld [vmem:[#allocation2 + $0x1] ss:$8 sm:$0xf] }
  0xf0   :  { %514 = vmatpush.msrb.mxu0 %v2303_v63  ;;  %534 = vmatpush.msrb.mxu1 %v2304_v55 }
  0xf1   :  { %554 = vmatpush.msrb.mxu2 %v2305_v62  ;;  %574 = vmatpush.msrb.mxu3 %v2306_v54 }
 0x14d   :  { %v310_v49 = vpop.f32.mrf.mxu1  ;;  %v290_v42 = vpop.f32.mrf.mxu0 }
 0x14e   :  { %v359_v56 = vrot.slane %v310_v49, 7 }
 0x150   :  { %v362_v38 = vsel %vm246_vm0, %v290_v42, %v359_v56 }
 0x154   :  { %v330_v53 = vpop.f32.mrf.mxu2  ;;  %v350_v57 = vpop.f32.mrf.mxu3 }
 0x155   :  { %v360_v48 = vrot.slane %v330_v53, 6  ;;  %v361_v58 = vrot.slane %v350_v57, 5 }
 0x157   :  { %v363_v44 = vsel %vm248_vm1, %v360_v48, %v361_v58 }
 0x158   :  { %v364_v63 = vsel %vm250_vm2, %v362_v38, %v363_v44  ;;  %v2324_v38 = vld [vmem:[#allocation34_spill] sm:$0xff]  ;;  %v2325_v44 = vld [vmem:[#allocation33_spill] sm:$0xff] }
 0x159   :  { %v366_v43 = vadd.f32 %v364_v63, %v354_v39  ;;  %v2326_v39 = vld [vmem:[#allocation29_spill] sm:$0xff]  ;;  %v2327_v63 = vld [vmem:[#allocation30_spill] sm:$0xff] }
 0x15b   :  { %1134 = vtanh.f32 %v366_v43  ;;  %v2322_v43 = vld [vmem:[#allocation25_spill] sm:$0xff] }
 0x161   :  { %v1135_v55 = vpop.eup %1134 }
 0x162   :  { %v368_v62 = vmul.f32 0.5, %v1135_v55  ;;  %v371_v52 = vrot.slane %v1135_v55, 1  ;;  %v380_v46 = vrot.slane %v1135_v55, 2  ;;  %v375_v50 = vrot.slane %v1135_v55, 3 }
 0x164   :  { %v369_v54 = vadd.f32 0.5, %v368_v62  ;;  %v373_v47 = vmul.f32 0.5, %v371_v52  ;;  %v377_v42 = vmul.f32 0.5, %v375_v50  ;;  %v2318_v50 = vld [vmem:[#allocation21_spill] sm:$0xff]  ;;  %v2321_v52 = vld [vmem:[#allocation31_spill] sm:$0xff] }
 0x166   :  { %v374_v49 = vadd.f32 0.5, %v373_v47  ;;  %v382_v57 = vmul.f32 %v380_v46, %v369_v54  ;;  %v378_v48 = vadd.f32 0.5, %v377_v42  ;;  %v2319_v46 = vld [vmem:[#allocation22_spill] sm:$0xff]  ;;  %v2320_v47 = vld [vmem:[#allocation32_spill] sm:$0xff] }
 0x167   :  { %v2323_v54 = vld [vmem:[#allocation26_spill] sm:$0xff] }
 0x168   :  { %v379_v53 = vmul.f32 %v374_v49, %v1686_v59  ;;  %v2317_v59 = vld [vmem:[#allocation27_spill] sm:$0xff] }
 0x16a   :  { %v1757_v61 = vadd.f32 %v382_v57, %v379_v53 }
 0x16c   :  { %1136 = vtanh.f32 %v1757_v61 }
 0x172   :  { %v1137_v56 = vpop.eup %1136 }
 0x173   :  { %v385_v58 = vmul.f32 %v1137_v56, %v378_v48 }
 0x175   :  { %402 = vmatmul.f32.vlgmr.msra.gmra.mxu0 %v385_v58  ;;  %422 = vmatmul.f32.vlgmr.msra.gmra.mxu1 %v385_v58 }
 0x176   :  { %442 = vmatmul.f32.vlgmr.msra.gmra.mxu2 %v385_v58  ;;  %462 = vmatmul.f32.vlgmr.msra.gmra.mxu3 %v385_v58 }
 0x177   :  { %612 = vmatpush.msra.mxu0 %v1372_v7  ;;  %632 = vmatpush.msra.mxu1 %v1368_v6 }
 0x178   :  { %652 = vmatpush.msra.mxu2 %v1354_v0  ;;  %672 = vmatpush.msra.mxu3 %v1356_v1  ;;  %v2307_v0 = vld [vmem:[#allocation13_spill] sm:$0xff]  ;;  %v2308_v1 = vld [vmem:[#allocation20_spill] sm:$0xff] }
 0x179   :  { %613 = vmatpush.msra.mxu0 %v1382_v11  ;;  %633 = vmatpush.msra.mxu1 %v1374_v8 }
 0x17a   :  { %653 = vmatpush.msra.mxu2 %v1358_v2  ;;  %673 = vmatpush.msra.mxu3 %v1362_v3  ;;  %v2309_v2 = vld [vmem:[#allocation19_spill] sm:$0xff]  ;;  %v2310_v3 = vld [vmem:[#allocation14_spill] sm:$0xff] }
 0x17b   :  { %614 = vmatpush.msra.mxu0 %v1388_v13  ;;  %634 = vmatpush.msra.mxu1 %v1386_v12 }
 0x17c   :  { %654 = vmatpush.msra.mxu2 %v1364_v4  ;;  %674 = vmatpush.msra.mxu3 %v1366_v5  ;;  %v2311_v4 = vld [vmem:[#allocation15_spill] sm:$0xff]  ;;  %v2312_v5 = vld [vmem:[#allocation24_spill] sm:$0xff] }
 0x17d   :  { %615 = vmatpush.msra.mxu0 %v1400_v17  ;;  %635 = vmatpush.msra.mxu1 %v1398_v16 }
 0x17e   :  { %655 = vmatpush.msra.mxu2 %v1377_v9  ;;  %675 = vmatpush.msra.mxu3 %v1379_v10  ;;  %v2313_v9 = vld [vmem:[#allocation23_spill] sm:$0xff]  ;;  %v2314_v10 = vld [vmem:[#allocation17_spill] sm:$0xff] }
 0x17f   :  { %616 = vmatpush.msra.mxu0 %v1412_v21  ;;  %636 = vmatpush.msra.mxu1 %v1410_v20 }
 0x180   :  { %656 = vmatpush.msra.mxu2 %v1391_v14  ;;  %676 = vmatpush.msra.mxu3 %v1393_v15  ;;  %v2315_v14 = vld [vmem:[#allocation18_spill] sm:$0xff]  ;;  %v2316_v15 = vld [vmem:[#allocation28_spill] sm:$0xff] }
 0x181   :  { %617 = vmatpush.msra.mxu0 %v1424_v25  ;;  %637 = vmatpush.msra.mxu1 %v1422_v24 }
 0x182   :  { %657 = vmatpush.msra.mxu2 %v1403_v18  ;;  %677 = vmatpush.msra.mxu3 %v1405_v19 }
 0x183   :  { %618 = vmatpush.msra.mxu0 %v1436_v29  ;;  %638 = vmatpush.msra.mxu1 %v1434_v28 }
 0x184   :  { %658 = vmatpush.msra.mxu2 %v1415_v22  ;;  %678 = vmatpush.msra.mxu3 %v1417_v23 }
 0x185   :  { %619 = vmatpush.msra.mxu0 %v1448_v33  ;;  %639 = vmatpush.msra.mxu1 %v1446_v32 }
 0x186   :  { %659 = vmatpush.msra.mxu2 %v1427_v26  ;;  %679 = vmatpush.msra.mxu3 %v1429_v27 }
 0x187   :  { %620 = vmatpush.msra.mxu0 %v1460_v37  ;;  %640 = vmatpush.msra.mxu1 %v1458_v36 }
 0x188   :  { %660 = vmatpush.msra.mxu2 %v1439_v30  ;;  %680 = vmatpush.msra.mxu3 %v1441_v31 }
 0x189   :  { %621 = vmatpush.msra.mxu0 %v1472_v41  ;;  %641 = vmatpush.msra.mxu1 %v1470_v40 }
 0x18a   :  { %661 = vmatpush.msra.mxu2 %v1451_v34  ;;  %681 = vmatpush.msra.mxu3 %v1453_v35 }
 0x18b   :  { %622 = vmatpush.msra.mxu0 %v1484_v45  ;;  %642 = vmatpush.msra.mxu1 %v2284_v51 }
 0x18c   :  { %662 = vmatpush.msra.mxu2 %v2285_v60  ;;  %682 = vmatpush.msra.mxu3 %v2307_v0 }
 0x18d   :  { %623 = vmatpush.msra.mxu0 %v2308_v1  ;;  %643 = vmatpush.msra.mxu1 %v2309_v2 }
 0x18e   :  { %663 = vmatpush.msra.mxu2 %v2310_v3  ;;  %683 = vmatpush.msra.mxu3 %v2311_v4 }
 0x18f   :  { %624 = vmatpush.msra.mxu0 %v2312_v5  ;;  %644 = vmatpush.msra.mxu1 %v2313_v9 }
 0x190   :  { %664 = vmatpush.msra.mxu2 %v2314_v10  ;;  %684 = vmatpush.msra.mxu3 %v2315_v14 }
 0x191   :  { %625 = vmatpush.msra.mxu0 %v2316_v15  ;;  %645 = vmatpush.msra.mxu1 %v2317_v59 }
 0x192   :  { %665 = vmatpush.msra.mxu2 %v2318_v50  ;;  %685 = vmatpush.msra.mxu3 %v2319_v46 }
 0x193   :  { %626 = vmatpush.msra.mxu0 %v2320_v47  ;;  %646 = vmatpush.msra.mxu1 %v2321_v52 }
 0x194   :  { %666 = vmatpush.msra.mxu2 %v2322_v43  ;;  %686 = vmatpush.msra.mxu3 %v2323_v54  ;;  %v467_v54 = vld [vmem:[#allocation2 + $0x2] ss:$8 sm:$0xf] }
 0x195   :  { %627 = vmatpush.msra.mxu0 %v2324_v38  ;;  %647 = vmatpush.msra.mxu1 %v2325_v44 }
 0x196   :  { %667 = vmatpush.msra.mxu2 %v2326_v39  ;;  %687 = vmatpush.msra.mxu3 %v2327_v63 }
 0x1f2   :  { %v423_v55 = vpop.f32.mrf.mxu1  ;;  %v403_v48 = vpop.f32.mrf.mxu0 }
 0x1f3   :  { %v472_v62 = vrot.slane %v423_v55, 7 }
 0x1f5   :  { %v475_v56 = vsel %vm246_vm0, %v403_v48, %v472_v62  ;;  %v1946_v48 = vld [vmem:[#allocation3 + $0x180] sm:$0xff] }
 0x1f9   :  { %v443_v49 = vpop.f32.mrf.mxu2  ;;  %v463_v53 = vpop.f32.mrf.mxu3 }
 0x1fa   :  { %v473_v57 = vrot.slane %v443_v49, 6  ;;  %v474_v42 = vrot.slane %v463_v53, 5 }
 0x1fc   :  { %v476_v58 = vsel %vm248_vm1, %v473_v57, %v474_v42 }
 0x1fd   :  { %v477_v38 = vsel %vm250_vm2, %v475_v56, %v476_v58  ;;  %v1949_v56 = vld [vmem:[#allocation3 + $0x188] sm:$0xff]  ;;  %v1954_v58 = vld [vmem:[#allocation3 + $0x160] sm:$0xff] }
 0x1fe   :  { %v479_v43 = vadd.f32 %v477_v38, %v467_v54  ;;  %v1925_v38 = vld [vmem:[#allocation3 + $0x1e8] sm:$0xff] }
 0x200   :  { %1138 = vtanh.f32 %v479_v43  ;;  %v1922_v43 = vld [vmem:[#allocation3 + $0x1e0] sm:$0xff] }
 0x206   :  { %v1139_v44 = vpop.eup %1138 }
 0x207   :  { %v481_v39 = vmul.f32 0.5, %v1139_v44  ;;  %v484_v52 = vrot.slane %v1139_v44, 1  ;;  %v493_v46 = vrot.slane %v1139_v44, 2  ;;  %v488_v50 = vrot.slane %v1139_v44, 3  ;;  %v1933_v44 = vld [vmem:[#allocation3 + $0x1c8] sm:$0xff] }
 0x209   :  { %v482_v63 = vadd.f32 0.5, %v481_v39  ;;  %v486_v47 = vmul.f32 0.5, %v484_v52  ;;  %v490_v62 = vmul.f32 0.5, %v488_v50  ;;  %v1841_v50 = vld [vmem:[#allocation3 + $0x1d0] sm:$0xff]  ;;  %v1938_v39 = vld [vmem:[#allocation3 + $0x1a0] sm:$0xff] }
 0x20b   :  { %v487_v55 = vadd.f32 0.5, %v486_v47  ;;  %v495_v53 = vmul.f32 %v493_v46, %v482_v63  ;;  %v491_v57 = vadd.f32 0.5, %v490_v62  ;;  %v1833_v47 = vld [vmem:[#allocation3 + $0x1f0] sm:$0xff]  ;;  %v1844_v46 = vld [vmem:[#allocation3 + $0x1d8] sm:$0xff]  ;;  %v1941_v63 = vld [vmem:[#allocation3 + $0x1a8] sm:$0xff] }
 0x20c   :  { %v1968_v62 = vld [vmem:[#allocation3 + $0x150] sm:$0xff] }
 0x20d   :  { %v492_v49 = vmul.f32 %v487_v55, %v1757_v61  ;;  %v1836_v61 = vld [vmem:[#allocation3 + $0x1f8] sm:$0xff]  ;;  %v1957_v55 = vld [vmem:[#allocation3 + $0x168] sm:$0xff] }
 0x20f   :  { %v1828_v59 = vadd.f32 %v495_v53, %v492_v49  ;;  %v1962_v49 = vld [vmem:[#allocation3 + $0x140] sm:$0xff]  ;;  %v1965_v53 = vld [vmem:[#allocation3 + $0x148] sm:$0xff] }
 0x211   :  { %1140 = vtanh.f32 %v1828_v59 }
 0x217   :  { %v1141_v42 = vpop.eup %1140 }
 0x218   :  { %v498_v54 = vmul.f32 %v1141_v42, %v491_v57  ;;  %v1971_v57 = vld [vmem:[#allocation3 + $0x158] sm:$0xff]  ;;  %v1974_v42 = vld [vmem:[#allocation3 + $0x120] sm:$0xff] }
 0x21a   :  { %515 = vmatmul.f32.vlgmr.msrb.gmra.mxu0 %v498_v54  ;;  %535 = vmatmul.f32.vlgmr.msrb.gmra.mxu1 %v498_v54 }
 0x21b   :  { %555 = vmatmul.f32.vlgmr.msrb.gmra.mxu2 %v498_v54  ;;  %575 = vmatmul.f32.vlgmr.msrb.gmra.mxu3 %v498_v54  ;;  %v1977_v54 = vld [vmem:[#allocation3 + $0x128] sm:$0xff] }
 0x21c   :  { %725 = vmatpush.msrb.mxu0 %v1372_v7  ;;  %745 = vmatpush.msrb.mxu1 %v1368_v6  ;;  %v1849_v6 = vld [vmem:[#allocation3 + $0x1b0] sm:$0xff]  ;;  %v1852_v7 = vld [vmem:[#allocation3 + $0x1b8] sm:$0xff] }
 0x21d   :  { %765 = vmatpush.msrb.mxu2 %v1833_v47  ;;  %785 = vmatpush.msrb.mxu3 %v1836_v61 }
 0x21e   :  { %726 = vmatpush.msrb.mxu0 %v1382_v11  ;;  %746 = vmatpush.msrb.mxu1 %v1374_v8  ;;  %v1857_v8 = vld [vmem:[#allocation3 + $0x190] sm:$0xff]  ;;  %v1860_v11 = vld [vmem:[#allocation3 + $0x198] sm:$0xff] }
 0x21f   :  { %766 = vmatpush.msrb.mxu2 %v1841_v50  ;;  %786 = vmatpush.msrb.mxu3 %v1844_v46 }
 0x220   :  { %727 = vmatpush.msrb.mxu0 %v1388_v13  ;;  %747 = vmatpush.msrb.mxu1 %v1386_v12  ;;  %v1865_v12 = vld [vmem:[#allocation3 + $0x170] sm:$0xff]  ;;  %v1868_v13 = vld [vmem:[#allocation3 + $0x178] sm:$0xff] }
 0x221   :  { %767 = vmatpush.msrb.mxu2 %v1849_v6  ;;  %787 = vmatpush.msrb.mxu3 %v1852_v7 }
 0x222   :  { %728 = vmatpush.msrb.mxu0 %v1400_v17  ;;  %748 = vmatpush.msrb.mxu1 %v1398_v16  ;;  %v2328_v16 = vld [vmem:[#allocation27_spill] sm:$0xff]  ;;  %v2329_v17 = vld [vmem:[#allocation21_spill] sm:$0xff] }
 0x223   :  { %768 = vmatpush.msrb.mxu2 %v1857_v8  ;;  %788 = vmatpush.msrb.mxu3 %v1860_v11 }
 0x224   :  { %729 = vmatpush.msrb.mxu0 %v1412_v21  ;;  %749 = vmatpush.msrb.mxu1 %v1410_v20  ;;  %v2332_v20 = vld [vmem:[#allocation31_spill] sm:$0xff]  ;;  %v2333_v21 = vld [vmem:[#allocation25_spill] sm:$0xff] }
 0x225   :  { %769 = vmatpush.msrb.mxu2 %v1865_v12  ;;  %789 = vmatpush.msrb.mxu3 %v1868_v13 }
 0x226   :  { %730 = vmatpush.msrb.mxu0 %v1424_v25  ;;  %750 = vmatpush.msrb.mxu1 %v1422_v24  ;;  %v2336_v24 = vld [vmem:[#allocation33_spill] sm:$0xff] }
 0x227   :  { %770 = vmatpush.msrb.mxu2 %v1403_v18  ;;  %790 = vmatpush.msrb.mxu3 %v1405_v19  ;;  %v2330_v18 = vld [vmem:[#allocation22_spill] sm:$0xff]  ;;  %v2331_v19 = vld [vmem:[#allocation32_spill] sm:$0xff]  ;;  %v2337_v25 = vld [vmem:[#allocation29_spill] sm:$0xff] }
 0x228   :  { %731 = vmatpush.msrb.mxu0 %v1436_v29  ;;  %751 = vmatpush.msrb.mxu1 %v1434_v28 }
 0x229   :  { %771 = vmatpush.msrb.mxu2 %v1415_v22  ;;  %791 = vmatpush.msrb.mxu3 %v1417_v23  ;;  %v2334_v22 = vld [vmem:[#allocation26_spill] sm:$0xff] }
 0x22a   :  { %732 = vmatpush.msrb.mxu0 %v1448_v33  ;;  %752 = vmatpush.msrb.mxu1 %v1446_v32  ;;  %v2335_v23 = vld [vmem:[#allocation34_spill] sm:$0xff] }
 0x22b   :  { %772 = vmatpush.msrb.mxu2 %v1427_v26  ;;  %792 = vmatpush.msrb.mxu3 %v1429_v27  ;;  %v2338_v26 = vld [vmem:[#allocation30_spill] sm:$0xff] }
 0x22c   :  { %733 = vmatpush.msrb.mxu0 %v1460_v37  ;;  %753 = vmatpush.msrb.mxu1 %v1458_v36  ;;  %v580_v36 = vld [vmem:[#allocation2 + $0x3] ss:$8 sm:$0xf] }
 0x22d   :  { %773 = vmatpush.msrb.mxu2 %v1439_v30  ;;  %793 = vmatpush.msrb.mxu3 %v1441_v31 }
 0x22e   :  { %734 = vmatpush.msrb.mxu0 %v1472_v41  ;;  %754 = vmatpush.msrb.mxu1 %v1470_v40 }
 0x22f   :  { %774 = vmatpush.msrb.mxu2 %v1451_v34  ;;  %794 = vmatpush.msrb.mxu3 %v1453_v35 }
 0x230   :  { %735 = vmatpush.msrb.mxu0 %v1484_v45  ;;  %755 = vmatpush.msrb.mxu1 %v2284_v51 }
 0x231   :  { %775 = vmatpush.msrb.mxu2 %v2285_v60  ;;  %795 = vmatpush.msrb.mxu3 %v2307_v0 }
 0x232   :  { %736 = vmatpush.msrb.mxu0 %v2308_v1  ;;  %756 = vmatpush.msrb.mxu1 %v2309_v2 }
 0x233   :  { %776 = vmatpush.msrb.mxu2 %v2310_v3  ;;  %796 = vmatpush.msrb.mxu3 %v2311_v4 }
 0x234   :  { %737 = vmatpush.msrb.mxu0 %v2312_v5  ;;  %757 = vmatpush.msrb.mxu1 %v2313_v9 }
 0x235   :  { %777 = vmatpush.msrb.mxu2 %v2314_v10  ;;  %797 = vmatpush.msrb.mxu3 %v2315_v14 }
 0x236   :  { %738 = vmatpush.msrb.mxu0 %v2316_v15  ;;  %758 = vmatpush.msrb.mxu1 %v2328_v16  ;;  %v1980_v16 = vld [vmem:[#allocation3 + $0x130] sm:$0xff] }
 0x237   :  { %778 = vmatpush.msrb.mxu2 %v2329_v17  ;;  %798 = vmatpush.msrb.mxu3 %v2330_v18  ;;  %v1983_v17 = vld [vmem:[#allocation3 + $0x138] sm:$0xff]  ;;  %v1986_v18 = vld [vmem:[#allocation3 + $0x100] sm:$0xff] }
 0x238   :  { %739 = vmatpush.msrb.mxu0 %v2331_v19  ;;  %759 = vmatpush.msrb.mxu1 %v2332_v20  ;;  %v1989_v19 = vld [vmem:[#allocation3 + $0x108] sm:$0xff]  ;;  %v1992_v20 = vld [vmem:[#allocation3 + $0x110] sm:$0xff] }
 0x239   :  { %779 = vmatpush.msrb.mxu2 %v2333_v21  ;;  %799 = vmatpush.msrb.mxu3 %v2334_v22  ;;  %v1995_v21 = vld [vmem:[#allocation3 + $0x118] sm:$0xff]  ;;  %v1998_v22 = vld [vmem:[#allocation3 + $0xe0] sm:$0xff] }
 0x23a   :  { %740 = vmatpush.msrb.mxu0 %v2335_v23  ;;  %760 = vmatpush.msrb.mxu1 %v2336_v24  ;;  %v2001_v23 = vld [vmem:[#allocation3 + $0xe8] sm:$0xff]  ;;  %v2004_v24 = vld [vmem:[#allocation3 + $0xf0] sm:$0xff] }
 0x23b   :  { %780 = vmatpush.msrb.mxu2 %v2337_v25  ;;  %800 = vmatpush.msrb.mxu3 %v2338_v26  ;;  %v2007_v25 = vld [vmem:[#allocation3 + $0xf8] sm:$0xff]  ;;  %v2010_v26 = vld [vmem:[#allocation3 + $0xc0] sm:$0xff] }
 0x297   :  { %v536_v27 = vpop.f32.mrf.mxu1  ;;  %v516_v33 = vpop.f32.mrf.mxu0 }
 0x298   :  { %v585_v28 = vrot.slane %v536_v27, 7  ;;  %v2013_v27 = vld [vmem:[#allocation3 + $0xc8] sm:$0xff] }
 0x29a   :  { %v588_v34 = vsel %vm246_vm0, %v516_v33, %v585_v28  ;;  %v2016_v28 = vld [vmem:[#allocation3 + $0xd0] sm:$0xff]  ;;  %v2031_v33 = vld [vmem:[#allocation3 + $0xb8] sm:$0xff] }
 0x29b   :  { %2339 = vst [vmem:[#allocation16_spill] sm:$0xff] %v2031_v33 }
 0x29e   :  { %v556_v29 = vpop.f32.mrf.mxu2  ;;  %v576_v30 = vpop.f32.mrf.mxu3 }
 0x29f   :  { %v586_v31 = vrot.slane %v556_v29, 6  ;;  %v587_v32 = vrot.slane %v576_v30, 5  ;;  %v2019_v29 = vld [vmem:[#allocation3 + $0xd8] sm:$0xff]  ;;  %v2022_v30 = vld [vmem:[#allocation3 + $0xa0] sm:$0xff] }
 0x2a1   :  { %v589_v35 = vsel %vm248_vm1, %v586_v31, %v587_v32  ;;  %v2025_v31 = vld [vmem:[#allocation3 + $0xa8] sm:$0xff]  ;;  %v2028_v32 = vld [vmem:[#allocation3 + $0xb0] sm:$0xff] }
 0x2a2   :  { %v590_v37 = vsel %vm250_vm2, %v588_v34, %v589_v35  ;;  %v2034_v34 = vld [vmem:[#allocation3 + $0x80] sm:$0xff]  ;;  %v2037_v35 = vld [vmem:[#allocation3 + $0x88] sm:$0xff] }
 0x2a3   :  { %v592_v40 = vadd.f32 %v590_v37, %v580_v36  ;;  %2340 = vst [vmem:[#allocation12_spill] sm:$0xff] %v2034_v34  ;;  %v2040_v36 = vld [vmem:[#allocation3 + $0x90] sm:$0xff]  ;;  %v2043_v37 = vld [vmem:[#allocation3 + $0x98] sm:$0xff] }
 0x2a4   :  { %2341 = vst [vmem:[#allocation13_spill] sm:$0xff] %v2037_v35 }
 0x2a5   :  { %1142 = vtanh.f32 %v592_v40  ;;  %2342 = vst [vmem:[#allocation20_spill] sm:$0xff] %v2040_v36  ;;  %v2046_v40 = vld [vmem:[#allocation3 + $0x60] sm:$0xff] }
 0x2a6   :  { %2343 = vst [vmem:[#allocation19_spill] sm:$0xff] %v2043_v37 }
 0x2a7   :  { %2344 = vst [vmem:[#allocation14_spill] sm:$0xff] %v2046_v40 }
 0x2ab   :  { %v1143_v41 = vpop.eup %1142 }
 0x2ac   :  { %v594_v45 = vmul.f32 0.5, %v1143_v41  ;;  %v597_v51 = vrot.slane %v1143_v41, 1  ;;  %v606_v2 = vrot.slane %v1143_v41, 2  ;;  %v601_v5 = vrot.slane %v1143_v41, 3  ;;  %v2049_v41 = vld [vmem:[#allocation3 + $0x68] sm:$0xff] }
 0x2ad   :  { %2345 = vst [vmem:[#allocation15_spill] sm:$0xff] %v2049_v41 }
 0x2ae   :  { %v595_v60 = vadd.f32 0.5, %v594_v45  ;;  %v599_v0 = vmul.f32 0.5, %v597_v51  ;;  %v603_v10 = vmul.f32 0.5, %v601_v5  ;;  %v2052_v45 = vld [vmem:[#allocation3 + $0x70] sm:$0xff]  ;;  %v2055_v51 = vld [vmem:[#allocation3 + $0x78] sm:$0xff] }
 0x2af   :  { %2346 = vst [vmem:[#allocation24_spill] sm:$0xff] %v2052_v45  ;;  %v2076_v5 = vld [vmem:[#allocation3 + $0x30] sm:$0xff] }
 0x2b0   :  { %v600_v1 = vadd.f32 0.5, %v599_v0  ;;  %v608_v4 = vmul.f32 %v606_v2, %v595_v60  ;;  %v604_v14 = vadd.f32 0.5, %v603_v10  ;;  %2347 = vst [vmem:[#allocation23_spill] sm:$0xff] %v2055_v51  ;;  %v2058_v60 = vld [vmem:[#allocation3 + $0x40] sm:$0xff]  ;;  %v2061_v0 = vld [vmem:[#allocation3 + $0x48] sm:$0xff]  ;;  %v2067_v2 = vld [vmem:[#allocation3 + $0x58] sm:$0xff] }
 0x2b1   :  { %2348 = vst [vmem:[#allocation17_spill] sm:$0xff] %v2058_v60  ;;  %v2079_v10 = vld [vmem:[#allocation3 + $0x38] sm:$0xff] }
 0x2b2   :  { %v605_v3 = vmul.f32 %v600_v1, %v1828_v59  ;;  %v1930_v59 = vld [vmem:[#allocation3 + $0x1c0] sm:$0xff]  ;;  %2349 = vst [vmem:[#allocation18_spill] sm:$0xff] %v2061_v0  ;;  %v2064_v1 = vld [vmem:[#allocation3 + $0x50] sm:$0xff] }
 0x2b3   :  { %2350 = vst [vmem:[#allocation28_spill] sm:$0xff] %v2064_v1 }
 0x2b4   :  { %v1919_v9 = vadd.f32 %v608_v4, %v605_v3  ;;  %2351 = vst [vmem:[#allocation27_spill] sm:$0xff] %v2067_v2  ;;  %v2070_v3 = vld [vmem:[#allocation3 + $0x20] sm:$0xff]  ;;  %v2073_v4 = vld [vmem:[#allocation3 + $0x28] sm:$0xff] }
 0x2b5   :  { %2352 = vst [vmem:[#allocation21_spill] sm:$0xff] %v2070_v3 }
 0x2b6   :  { %1144 = vtanh.f32 %v1919_v9  ;;  %2353 = vst [vmem:[#allocation22_spill] sm:$0xff] %v2073_v4 }
 0x2b7   :  { %2354 = vst [vmem:[#allocation32_spill] sm:$0xff] %v2076_v5 }
 0x2b8   :  { %2355 = vst [vmem:[#allocation31_spill] sm:$0xff] %v2079_v10 }
 0x2bc   :  { %v1145_v15 = vpop.eup %1144 }
 0x2bd   :  { %v611_v52 = vmul.f32 %v1145_v15, %v604_v14  ;;  %v2082_v14 = vld [vmem:[#allocation3] sm:$0xff]  ;;  %v2085_v15 = vld [vmem:[#allocation3 + $0x8] sm:$0xff] }
 0x2be   :  { %2356 = vst [vmem:[#allocation25_spill] sm:$0xff] %v2082_v14 }
 0x2bf   :  { %628 = vmatmul.f32.vlgmr.msra.gmra.mxu0 %v611_v52  ;;  %648 = vmatmul.f32.vlgmr.msra.gmra.mxu1 %v611_v52  ;;  %2357 = vst [vmem:[#allocation26_spill] sm:$0xff] %v2085_v15 }
 0x2c0   :  { %668 = vmatmul.f32.vlgmr.msra.gmra.mxu2 %v611_v52  ;;  %688 = vmatmul.f32.vlgmr.msra.gmra.mxu3 %v611_v52  ;;  %v2088_v52 = vld [vmem:[#allocation3 + $0x10] sm:$0xff] }
 0x2c1   :  { %838 = vmatpush.msra.mxu0 %v1922_v43  ;;  %858 = vmatpush.msra.mxu1 %v1925_v38  ;;  %2358 = vst [vmem:[#allocation34_spill] sm:$0xff] %v2088_v52 }
 0x2c2   :  { %878 = vmatpush.msra.mxu2 %v1833_v47  ;;  %898 = vmatpush.msra.mxu3 %v1836_v61 }
 0x2c3   :  { %839 = vmatpush.msra.mxu0 %v1930_v59  ;;  %859 = vmatpush.msra.mxu1 %v1933_v44 }
 0x2c4   :  { %879 = vmatpush.msra.mxu2 %v1841_v50  ;;  %899 = vmatpush.msra.mxu3 %v1844_v46 }
 0x2c5   :  { %840 = vmatpush.msra.mxu0 %v1938_v39  ;;  %860 = vmatpush.msra.mxu1 %v1941_v63 }
 0x2c6   :  { %880 = vmatpush.msra.mxu2 %v1849_v6  ;;  %900 = vmatpush.msra.mxu3 %v1852_v7 }
 0x2c7   :  { %841 = vmatpush.msra.mxu0 %v1946_v48  ;;  %861 = vmatpush.msra.mxu1 %v1949_v56 }
 0x2c8   :  { %881 = vmatpush.msra.mxu2 %v1857_v8  ;;  %901 = vmatpush.msra.mxu3 %v1860_v11 }
 0x2c9   :  { %842 = vmatpush.msra.mxu0 %v1954_v58  ;;  %862 = vmatpush.msra.mxu1 %v1957_v55 }
 0x2ca   :  { %882 = vmatpush.msra.mxu2 %v1865_v12  ;;  %902 = vmatpush.msra.mxu3 %v1868_v13 }
 0x2cb   :  { %843 = vmatpush.msra.mxu0 %v1962_v49  ;;  %863 = vmatpush.msra.mxu1 %v1965_v53 }
 0x2cc   :  { %883 = vmatpush.msra.mxu2 %v1968_v62  ;;  %903 = vmatpush.msra.mxu3 %v1971_v57 }
 0x2cd   :  { %844 = vmatpush.msra.mxu0 %v1974_v42  ;;  %864 = vmatpush.msra.mxu1 %v1977_v54 }
 0x2ce   :  { %884 = vmatpush.msra.mxu2 %v1980_v16  ;;  %904 = vmatpush.msra.mxu3 %v1983_v17 }
 0x2cf   :  { %845 = vmatpush.msra.mxu0 %v1986_v18  ;;  %865 = vmatpush.msra.mxu1 %v1989_v19 }
 0x2d0   :  { %885 = vmatpush.msra.mxu2 %v1992_v20  ;;  %905 = vmatpush.msra.mxu3 %v1995_v21 }
 0x2d1   :  { %846 = vmatpush.msra.mxu0 %v1998_v22  ;;  %866 = vmatpush.msra.mxu1 %v2001_v23 }
 0x2d2   :  { %886 = vmatpush.msra.mxu2 %v2004_v24  ;;  %906 = vmatpush.msra.mxu3 %v2007_v25 }
 0x2d3   :  { %847 = vmatpush.msra.mxu0 %v2010_v26  ;;  %867 = vmatpush.msra.mxu1 %v2013_v27 }
 0x2d4   :  { %887 = vmatpush.msra.mxu2 %v2016_v28  ;;  %907 = vmatpush.msra.mxu3 %v2019_v29 }
 0x2d5   :  { %848 = vmatpush.msra.mxu0 %v2022_v30  ;;  %868 = vmatpush.msra.mxu1 %v2025_v31 }
 0x2d6   :  { %888 = vmatpush.msra.mxu2 %v2028_v32  ;;  %908 = vmatpush.msra.mxu3 %v2031_v33 }
 0x2d7   :  { %849 = vmatpush.msra.mxu0 %v2034_v34  ;;  %869 = vmatpush.msra.mxu1 %v2037_v35 }
 0x2d8   :  { %889 = vmatpush.msra.mxu2 %v2040_v36  ;;  %909 = vmatpush.msra.mxu3 %v2043_v37 }
 0x2d9   :  { %850 = vmatpush.msra.mxu0 %v2046_v40  ;;  %870 = vmatpush.msra.mxu1 %v2049_v41 }
 0x2da   :  { %890 = vmatpush.msra.mxu2 %v2052_v45  ;;  %910 = vmatpush.msra.mxu3 %v2055_v51 }
 0x2db   :  { %851 = vmatpush.msra.mxu0 %v2058_v60  ;;  %871 = vmatpush.msra.mxu1 %v2061_v0 }
 0x2dc   :  { %891 = vmatpush.msra.mxu2 %v2064_v1  ;;  %911 = vmatpush.msra.mxu3 %v2067_v2 }
 0x2dd   :  { %852 = vmatpush.msra.mxu0 %v2070_v3  ;;  %872 = vmatpush.msra.mxu1 %v2073_v4  ;;  %v2091_v4 = vld [vmem:[#allocation3 + $0x18] sm:$0xff] }
 0x2de   :  { %892 = vmatpush.msra.mxu2 %v2076_v5  ;;  %912 = vmatpush.msra.mxu3 %v2079_v10  ;;  %2359 = vst [vmem:[#allocation33_spill] sm:$0xff] %v2091_v4 }
 0x2df   :  { %853 = vmatpush.msra.mxu0 %v2082_v14  ;;  %873 = vmatpush.msra.mxu1 %v2085_v15  ;;  %v693_v15 = vld [vmem:[#allocation2 + $0x4] ss:$8 sm:$0xf] }
 0x2e0   :  { %893 = vmatpush.msra.mxu2 %v2088_v52  ;;  %913 = vmatpush.msra.mxu3 %v2091_v4 }
 0x33c   :  { %v649_v5 = vpop.f32.mrf.mxu1  ;;  %v629_v60 = vpop.f32.mrf.mxu0 }
 0x33d   :  { %v698_v3 = vrot.slane %v649_v5, 7 }
 0x33f   :  { %v701_v14 = vsel %vm246_vm0, %v629_v60, %v698_v3 }
 0x343   :  { %v669_v2 = vpop.f32.mrf.mxu2  ;;  %v689_v10 = vpop.f32.mrf.mxu3 }
 0x344   :  { %v699_v1 = vrot.slane %v669_v2, 6  ;;  %v700_v0 = vrot.slane %v689_v10, 5 }
 0x346   :  { %v702_v51 = vsel %vm248_vm1, %v699_v1, %v700_v0 }
 0x347   :  { %v703_v45 = vsel %vm250_vm2, %v701_v14, %v702_v51 }
 0x348   :  { %v705_v41 = vadd.f32 %v703_v45, %v693_v15 }
 0x34a   :  { %1146 = vtanh.f32 %v705_v41 }
 0x350   :  { %v1147_v52 = vpop.eup %1146 }
 0x351   :  { %v707_v40 = vmul.f32 0.5, %v1147_v52  ;;  %v710_v37 = vrot.slane %v1147_v52, 1  ;;  %v719_v35 = vrot.slane %v1147_v52, 2  ;;  %v714_v34 = vrot.slane %v1147_v52, 3 }
 0x353   :  { %v708_v4 = vadd.f32 0.5, %v707_v40  ;;  %v712_v36 = vmul.f32 0.5, %v710_v37  ;;  %v716_v60 = vmul.f32 0.5, %v714_v34 }
 0x355   :  { %v713_v5 = vadd.f32 0.5, %v712_v36  ;;  %v721_v10 = vmul.f32 %v719_v35, %v708_v4  ;;  %v717_v0 = vadd.f32 0.5, %v716_v60 }
 0x357   :  { %v718_v2 = vmul.f32 %v713_v5, %v1919_v9  ;;  %v2370_v9 = vld [vmem:[#allocation18_spill] sm:$0xff] }
 0x358   :  { %v919_v5 = vld [vmem:[#allocation2 + $0x6] ss:$8 sm:$0xf] }
 0x359   :  { %v2098_v33 = vadd.f32 %v721_v10, %v718_v2 }
 0x35b   :  { %1148 = vtanh.f32 %v2098_v33 }
 0x361   :  { %v1149_v51 = vpop.eup %1148 }
 0x362   :  { %v724_v45 = vmul.f32 %v1149_v51, %v717_v0 }
 0x364   :  { %741 = vmatmul.f32.vlgmr.msrb.gmra.mxu0 %v724_v45  ;;  %761 = vmatmul.f32.vlgmr.msrb.gmra.mxu1 %v724_v45 }
 0x365   :  { %781 = vmatmul.f32.vlgmr.msrb.gmra.mxu2 %v724_v45  ;;  %801 = vmatmul.f32.vlgmr.msrb.gmra.mxu3 %v724_v45 }
 0x366   :  { %951 = vmatpush.msrb.mxu0 %v1922_v43  ;;  %971 = vmatpush.msrb.mxu1 %v1925_v38  ;;  %v2371_v43 = vld [vmem:[#allocation28_spill] sm:$0xff]  ;;  %v2372_v38 = vld [vmem:[#allocation27_spill] sm:$0xff] }
 0x367   :  { %991 = vmatpush.msrb.mxu2 %v1833_v47  ;;  %1011 = vmatpush.msrb.mxu3 %v1836_v61  ;;  %v2360_v47 = vld [vmem:[#allocation16_spill] sm:$0xff] }
 0x368   :  { %952 = vmatpush.msrb.mxu0 %v1930_v59  ;;  %972 = vmatpush.msrb.mxu1 %v1933_v44  ;;  %v2361_v61 = vld [vmem:[#allocation12_spill] sm:$0xff]  ;;  %v2373_v59 = vld [vmem:[#allocation21_spill] sm:$0xff]  ;;  %v2374_v44 = vld [vmem:[#allocation22_spill] sm:$0xff] }
 0x369   :  { %992 = vmatpush.msrb.mxu2 %v1841_v50  ;;  %1012 = vmatpush.msrb.mxu3 %v1844_v46  ;;  %v2362_v50 = vld [vmem:[#allocation13_spill] sm:$0xff]  ;;  %v2363_v46 = vld [vmem:[#allocation20_spill] sm:$0xff] }
 0x36a   :  { %953 = vmatpush.msrb.mxu0 %v1938_v39  ;;  %973 = vmatpush.msrb.mxu1 %v1941_v63  ;;  %v2375_v39 = vld [vmem:[#allocation32_spill] sm:$0xff]  ;;  %v2376_v63 = vld [vmem:[#allocation31_spill] sm:$0xff] }
 0x36b   :  { %993 = vmatpush.msrb.mxu2 %v1849_v6  ;;  %1013 = vmatpush.msrb.mxu3 %v1852_v7  ;;  %v2364_v6 = vld [vmem:[#allocation19_spill] sm:$0xff]  ;;  %v2365_v7 = vld [vmem:[#allocation14_spill] sm:$0xff] }
 0x36c   :  { %954 = vmatpush.msrb.mxu0 %v1946_v48  ;;  %974 = vmatpush.msrb.mxu1 %v1949_v56  ;;  %v2377_v48 = vld [vmem:[#allocation25_spill] sm:$0xff]  ;;  %v2378_v56 = vld [vmem:[#allocation26_spill] sm:$0xff] }
 0x36d   :  { %994 = vmatpush.msrb.mxu2 %v1857_v8  ;;  %1014 = vmatpush.msrb.mxu3 %v1860_v11  ;;  %v2366_v8 = vld [vmem:[#allocation15_spill] sm:$0xff]  ;;  %v2367_v11 = vld [vmem:[#allocation24_spill] sm:$0xff] }
 0x36e   :  { %955 = vmatpush.msrb.mxu0 %v1954_v58  ;;  %975 = vmatpush.msrb.mxu1 %v1957_v55  ;;  %v2379_v58 = vld [vmem:[#allocation34_spill] sm:$0xff]  ;;  %v2380_v55 = vld [vmem:[#allocation33_spill] sm:$0xff] }
 0x36f   :  { %995 = vmatpush.msrb.mxu2 %v1865_v12  ;;  %1015 = vmatpush.msrb.mxu3 %v1868_v13  ;;  %v2368_v12 = vld [vmem:[#allocation23_spill] sm:$0xff]  ;;  %v2369_v13 = vld [vmem:[#allocation17_spill] sm:$0xff] }
 0x370   :  { %956 = vmatpush.msrb.mxu0 %v1962_v49  ;;  %976 = vmatpush.msrb.mxu1 %v1965_v53 }
 0x371   :  { %996 = vmatpush.msrb.mxu2 %v1968_v62  ;;  %1016 = vmatpush.msrb.mxu3 %v1971_v57 }
 0x372   :  { %957 = vmatpush.msrb.mxu0 %v1974_v42  ;;  %977 = vmatpush.msrb.mxu1 %v1977_v54 }
 0x373   :  { %997 = vmatpush.msrb.mxu2 %v1980_v16  ;;  %1017 = vmatpush.msrb.mxu3 %v1983_v17 }
 0x374   :  { %958 = vmatpush.msrb.mxu0 %v1986_v18  ;;  %978 = vmatpush.msrb.mxu1 %v1989_v19  ;;  %v806_v19 = vld [vmem:[#allocation2 + $0x5] ss:$8 sm:$0xf] }
 0x375   :  { %998 = vmatpush.msrb.mxu2 %v1992_v20  ;;  %1018 = vmatpush.msrb.mxu3 %v1995_v21 }
 0x376   :  { %959 = vmatpush.msrb.mxu0 %v1998_v22  ;;  %979 = vmatpush.msrb.mxu1 %v2001_v23 }
 0x377   :  { %999 = vmatpush.msrb.mxu2 %v2004_v24  ;;  %1019 = vmatpush.msrb.mxu3 %v2007_v25 }
 0x378   :  { %960 = vmatpush.msrb.mxu0 %v2010_v26  ;;  %980 = vmatpush.msrb.mxu1 %v2013_v27 }
 0x379   :  { %1000 = vmatpush.msrb.mxu2 %v2016_v28  ;;  %1020 = vmatpush.msrb.mxu3 %v2019_v29 }
 0x37a   :  { %961 = vmatpush.msrb.mxu0 %v2022_v30  ;;  %981 = vmatpush.msrb.mxu1 %v2025_v31 }
 0x37b   :  { %1001 = vmatpush.msrb.mxu2 %v2028_v32  ;;  %1021 = vmatpush.msrb.mxu3 %v2360_v47 }
 0x37c   :  { %962 = vmatpush.msrb.mxu0 %v2361_v61  ;;  %982 = vmatpush.msrb.mxu1 %v2362_v50 }
 0x37d   :  { %1002 = vmatpush.msrb.mxu2 %v2363_v46  ;;  %1022 = vmatpush.msrb.mxu3 %v2364_v6 }
 0x37e   :  { %963 = vmatpush.msrb.mxu0 %v2365_v7  ;;  %983 = vmatpush.msrb.mxu1 %v2366_v8 }
 0x37f   :  { %1003 = vmatpush.msrb.mxu2 %v2367_v11  ;;  %1023 = vmatpush.msrb.mxu3 %v2368_v12 }
 0x380   :  { %964 = vmatpush.msrb.mxu0 %v2369_v13  ;;  %984 = vmatpush.msrb.mxu1 %v2370_v9 }
 0x381   :  { %1004 = vmatpush.msrb.mxu2 %v2371_v43  ;;  %1024 = vmatpush.msrb.mxu3 %v2372_v38  ;;  %v1079_v43 = vld [vmem:[#allocation6 + $0x78] sm:$0xff]  ;;  %v1078_v38 = vld [vmem:[#allocation6 + $0x70] sm:$0xff] }
 0x382   :  { %965 = vmatpush.msrb.mxu0 %v2373_v59  ;;  %985 = vmatpush.msrb.mxu1 %v2374_v44  ;;  %v1077_v59 = vld [vmem:[#allocation6 + $0x68] sm:$0xff]  ;;  %v1076_v44 = vld [vmem:[#allocation6 + $0x60] sm:$0xff] }
 0x383   :  { %1005 = vmatpush.msrb.mxu2 %v2375_v39  ;;  %1025 = vmatpush.msrb.mxu3 %v2376_v63  ;;  %v1075_v39 = vld [vmem:[#allocation6 + $0x58] sm:$0xff]  ;;  %v1074_v63 = vld [vmem:[#allocation6 + $0x50] sm:$0xff] }
 0x384   :  { %966 = vmatpush.msrb.mxu0 %v2377_v48  ;;  %986 = vmatpush.msrb.mxu1 %v2378_v56  ;;  %v1073_v48 = vld [vmem:[#allocation6 + $0x48] sm:$0xff]  ;;  %v1072_v56 = vld [vmem:[#allocation6 + $0x40] sm:$0xff] }
 0x385   :  { %1006 = vmatpush.msrb.mxu2 %v2379_v58  ;;  %1026 = vmatpush.msrb.mxu3 %v2380_v55  ;;  %v1071_v58 = vld [vmem:[#allocation6 + $0x38] sm:$0xff]  ;;  %v1070_v55 = vld [vmem:[#allocation6 + $0x30] sm:$0xff] }
 0x3e1   :  { %v762_v49 = vpop.f32.mrf.mxu1  ;;  %v742_v16 = vpop.f32.mrf.mxu0 }
 0x3e2   :  { %v811_v53 = vrot.slane %v762_v49, 7  ;;  %v1069_v49 = vld [vmem:[#allocation6 + $0x28] sm:$0xff] }
 0x3e4   :  { %v814_v17 = vsel %vm246_vm0, %v742_v16, %v811_v53  ;;  %v1068_v53 = vld [vmem:[#allocation6 + $0x20] sm:$0xff] }
 0x3e5   :  { %v1064_v16 = vld [vmem:[#allocation6] sm:$0xff] }
 0x3e8   :  { %v782_v62 = vpop.f32.mrf.mxu2  ;;  %v802_v57 = vpop.f32.mrf.mxu3 }
 0x3e9   :  { %v812_v42 = vrot.slane %v782_v62, 6  ;;  %v813_v54 = vrot.slane %v802_v57, 5  ;;  %v1067_v62 = vld [vmem:[#allocation6 + $0x18] sm:$0xff]  ;;  %v1066_v57 = vld [vmem:[#allocation6 + $0x10] sm:$0xff] }
 0x3eb   :  { %v815_v18 = vsel %vm248_vm1, %v812_v42, %v813_v54  ;;  %v1065_v42 = vld [vmem:[#allocation6 + $0x8] sm:$0xff] }
 0x3ec   :  { %v816_v20 = vsel %vm250_vm2, %v814_v17, %v815_v18 }
 0x3ed   :  { %v818_v21 = vadd.f32 %v816_v20, %v806_v19 }
 0x3ef   :  { %1150 = vtanh.f32 %v818_v21 }
 0x3f5   :  { %v1151_v22 = vpop.eup %1150 }
 0x3f6   :  { %v820_v23 = vmul.f32 0.5, %v1151_v22  ;;  %v823_v24 = vrot.slane %v1151_v22, 1  ;;  %v832_v28 = vrot.slane %v1151_v22, 2  ;;  %v827_v31 = vrot.slane %v1151_v22, 3 }
 0x3f8   :  { %v821_v25 = vadd.f32 0.5, %v820_v23  ;;  %v825_v26 = vmul.f32 0.5, %v823_v24  ;;  %v829_v34 = vmul.f32 0.5, %v827_v31 }
 0x3fa   :  { %v826_v27 = vadd.f32 0.5, %v825_v26  ;;  %v834_v30 = vmul.f32 %v832_v28, %v821_v25  ;;  %v830_v35 = vadd.f32 0.5, %v829_v34  ;;  %v1032_v25 = vld [vmem:[#allocation2 + $0x7] ss:$8 sm:$0xf] }
 0x3fc   :  { %v831_v29 = vmul.f32 %v826_v27, %v2098_v33 }
 0x3fe   :  { %v835_v32 = vadd.f32 %v834_v30, %v831_v29 }
 0x400   :  { %1152 = vtanh.f32 %v835_v32 }
 0x406   :  { %v1153_v36 = vpop.eup %1152 }
 0x407   :  { %v837_v37 = vmul.f32 %v1153_v36, %v830_v35 }
 0x409   :  { %854 = vmatmul.f32.vlgmr.msra.gmra.mxu0 %v837_v37  ;;  %874 = vmatmul.f32.vlgmr.msra.gmra.mxu1 %v837_v37 }
 0x40a   :  { %894 = vmatmul.f32.vlgmr.msra.gmra.mxu2 %v837_v37  ;;  %914 = vmatmul.f32.vlgmr.msra.gmra.mxu3 %v837_v37 }
 0x40b   :  { %1081 = vmatpush.msra.mxu0 %v1079_v43 }
 0x40d   :  { %1082 = vmatpush.msra.mxu0 %v1078_v38 }
 0x40f   :  { %1083 = vmatpush.msra.mxu0 %v1077_v59 }
 0x411   :  { %1084 = vmatpush.msra.mxu0 %v1076_v44 }
 0x413   :  { %1085 = vmatpush.msra.mxu0 %v1075_v39 }
 0x415   :  { %1086 = vmatpush.msra.mxu0 %v1074_v63 }
 0x417   :  { %1087 = vmatpush.msra.mxu0 %v1073_v48 }
 0x419   :  { %1088 = vmatpush.msra.mxu0 %v1072_v56 }
 0x41b   :  { %1089 = vmatpush.msra.mxu0 %v1071_v58 }
 0x41d   :  { %1090 = vmatpush.msra.mxu0 %v1070_v55 }
 0x41f   :  { %1091 = vmatpush.msra.mxu0 %v1069_v49 }
 0x421   :  { %1092 = vmatpush.msra.mxu0 %v1068_v53 }
 0x423   :  { %1093 = vmatpush.msra.mxu0 %v1067_v62 }
 0x425   :  { %1094 = vmatpush.msra.mxu0 %v1066_v57 }
 0x427   :  { %1095 = vmatpush.msra.mxu0 %v1065_v42 }
 0x429   :  { %1096 = vmatpush.msra.mxu0 %v1064_v16 }
 0x486   :  { %v875_v40 = vpop.f32.mrf.mxu1  ;;  %v855_v15 = vpop.f32.mrf.mxu0 }
 0x487   :  { %v924_v41 = vrot.slane %v875_v40, 7 }
 0x489   :  { %v927_v33 = vsel %vm246_vm0, %v855_v15, %v924_v41  ;;  %v1080_v15 = vld [vmem:[%s2186_s5] sm:$0x1] }
 0x48d   :  { %v895_v1 = vpop.f32.mrf.mxu2  ;;  %v915_v3 = vpop.f32.mrf.mxu3 }
 0x48e   :  { %v925_v4 = vrot.slane %v895_v1, 6  ;;  %v926_v14 = vrot.slane %v915_v3, 5 }
 0x490   :  { %v928_v52 = vsel %vm248_vm1, %v925_v4, %v926_v14 }
 0x491   :  { %v929_v2 = vsel %vm250_vm2, %v927_v33, %v928_v52 }
 0x492   :  { %v931_v10 = vadd.f32 %v929_v2, %v919_v5 }
 0x494   :  { %1154 = vtanh.f32 %v931_v10 }
 0x49a   :  { %v1155_v60 = vpop.eup %1154 }
 0x49b   :  { %v933_v0 = vmul.f32 0.5, %v1155_v60  ;;  %v936_v51 = vrot.slane %v1155_v60, 1  ;;  %v945_v50 = vrot.slane %v1155_v60, 2  ;;  %v940_v7 = vrot.slane %v1155_v60, 3 }
 0x49d   :  { %v934_v45 = vadd.f32 0.5, %v933_v0  ;;  %v938_v47 = vmul.f32 0.5, %v936_v51  ;;  %v942_v11 = vmul.f32 0.5, %v940_v7 }
 0x49f   :  { %v939_v61 = vadd.f32 0.5, %v938_v47  ;;  %v947_v6 = vmul.f32 %v945_v50, %v934_v45  ;;  %v943_v12 = vadd.f32 0.5, %v942_v11 }
 0x4a1   :  { %v944_v46 = vmul.f32 %v939_v61, %v835_v32 }
 0x4a3   :  { %v948_v8 = vadd.f32 %v947_v6, %v944_v46 }
 0x4a5   :  { %1156 = vtanh.f32 %v948_v8 }
 0x4ab   :  { %v1157_v13 = vpop.eup %1156 }
 0x4ac   :  { %v950_v9 = vmul.f32 %v1157_v13, %v943_v12 }
 0x4ae   :  { %967 = vmatmul.f32.vlgmr.msrb.gmra.mxu0 %v950_v9  ;;  %987 = vmatmul.f32.vlgmr.msrb.gmra.mxu1 %v950_v9 }
 0x4af   :  { %1007 = vmatmul.f32.vlgmr.msrb.gmra.mxu2 %v950_v9  ;;  %1027 = vmatmul.f32.vlgmr.msrb.gmra.mxu3 %v950_v9 }
 0x52b   :  { %v988_v54 = vpop.f32.mrf.mxu1  ;;  %v968_v22 = vpop.f32.mrf.mxu0 }
 0x52c   :  { %v1037_v17 = vrot.slane %v988_v54, 7 }
 0x52e   :  { %v1040_v23 = vsel %vm246_vm0, %v968_v22, %v1037_v17 }
 0x532   :  { %v1008_v18 = vpop.f32.mrf.mxu2  ;;  %v1028_v19 = vpop.f32.mrf.mxu3 }
 0x533   :  { %v1038_v20 = vrot.slane %v1008_v18, 6  ;;  %v1039_v21 = vrot.slane %v1028_v19, 5 }
 0x535   :  { %v1041_v24 = vsel %vm248_vm1, %v1038_v20, %v1039_v21 }
 0x536   :  { %v1042_v26 = vsel %vm250_vm2, %v1040_v23, %v1041_v24 }
 0x537   :  { %v1044_v27 = vadd.f32 %v1042_v26, %v1032_v25 }
 0x539   :  { %1158 = vtanh.f32 %v1044_v27 }
 0x53f   :  { %v1159_v28 = vpop.eup %1158 }
 0x540   :  { %v1046_v29 = vmul.f32 0.5, %v1159_v28  ;;  %v1049_v30 = vrot.slane %v1159_v28, 1  ;;  %v1058_v35 = vrot.slane %v1159_v28, 2  ;;  %v1053_v40 = vrot.slane %v1159_v28, 3 }
 0x542   :  { %v1047_v31 = vadd.f32 0.5, %v1046_v29  ;;  %v1051_v32 = vmul.f32 0.5, %v1049_v30  ;;  %v1055_v1 = vmul.f32 0.5, %v1053_v40 }
 0x544   :  { %v1052_v34 = vadd.f32 0.5, %v1051_v32  ;;  %v1060_v37 = vmul.f32 %v1058_v35, %v1047_v31  ;;  %v1056_v3 = vadd.f32 0.5, %v1055_v1 }
 0x546   :  { %v1057_v36 = vmul.f32 %v1052_v34, %v948_v8 }
 0x548   :  { %v1061_v41 = vadd.f32 %v1060_v37, %v1057_v36 }
 0x54a   :  { %1160 = vtanh.f32 %v1061_v41 }
 0x550   :  { %v1161_v4 = vpop.eup %1160 }
 0x551   :  { %v1063_v14 = vmul.f32 %v1161_v4, %v1056_v3 }
 0x553   :  { %1097 = vmatmul.f32.vlgmr.msra.gmra.mxu0 %v1063_v14 }
 0x5d0   :  { %v1098_v33 = vpop.f32.mrf.mxu0 }
 0x5d1   :  { %v1099_v52 = vadd.f32 %v1098_v33, %v1080_v15 }
 0x5d3   :  { %1101 = vst [vmem:[#allocation8] sm:$0x1] %v1099_v52 }
 0x5d4   :  { %1112 = dma.vmem_to_hbm [thread:$0]  %s1108_s15, 16, %s1110_s18, [#allocation5]  }
 0x5d5   :  { %1302 = dma.done.wait [#allocation5], 16  }
 0x5d6   :  { %1303 = vsyncadd [#allocation5], 4294967280 }
 0x5d7   :  { %1117 = vsyncpa [#allocation4], 1 }
 0x5d8   :  { %1118 = vsyncpa [#allocation7], 1 }
 0x5d9   :  { %1119 = vsyncpa [#allocation5], 1 }

</bundles_post_ra>
